<compile_context>
chip_gen: v7x
topology: tpu7x:2x2x1
jax: 0.10.0
libtpu: 0.0.40
codegen_flags: <defaults>
</compile_context>

<pallas_src>
import functools

import jax
import jax.numpy as jnp
import numpy as np
from jax import lax
from jax.experimental import pallas as pl
from jax.experimental.pallas import tpu as pltpu


# --------------------------------------------------------------------------- #
# Phase 1: conv3x3 -> LeakyReLU -> conv3x3 -> LeakyReLU   (row-tiled, im2col)  #
# --------------------------------------------------------------------------- #
def _conv_stack_kernel(x_ref, w1_ref, b1_ref, w2_ref, b2_ref, z_ref, psum_ref):
    """One (batch, row-tile) grid step.

    Ref shapes (leading squeezed dims removed by the BlockSpecs):
      x    : (Cin, TH+4, W)   bf16  halo tile (auto-pipelined, double-buffered)
      w1   : (Cmid, 9*Cin)    bf16  tap-major im2col weights
      b1   : (Cmid, 1)        f32
      w2   : (Cout, 9*Cmid)   bf16
      b2   : (Cout, 1)        f32
      z    : (Cout, TH*W2)    bf16  pre-SE activations of this row tile
      psum : (Cout, 1)        f32   per-tile channel sums (for the SE mean)
    """
    cin, th_in, w_full = x_ref.shape
    cmid = w1_ref.shape[0]
    w1c, w2c = w_full - 2, w_full - 4
    th1, th2 = th_in - 2, th_in - 4

    x = x_ref[...]                                            # bf16 (Cin, TH+4, W)

    # ---- conv1: im2col -> single bf16 MXU matmul (K = 9*Cin), f32 acc ----
    p1 = jnp.concatenate(
        [x[:, ky:ky + th1, kx:kx + w1c]
         for ky in range(3) for kx in range(3)], axis=0)
    p1 = p1.reshape(9 * cin, th1 * w1c)
    a1 = jnp.dot(w1_ref[...], p1, preferred_element_type=jnp.float32)
    a1 = a1 + b1_ref[...]
    a1 = jnp.maximum(a1, 0.1 * a1)                            # LeakyReLU(0.1)
    y1 = a1.astype(jnp.bfloat16).reshape(cmid, th1, w1c)

    # ---- conv2: same trick (K = 9*Cmid) ----
    # TODO(synk): if W2 is 128-aligned on real frames, kx-shifts via pltpu.roll
    # would remove the lane-misaligned im2col relayouts entirely.
    p2 = jnp.concatenate(
        [y1[:, ky:ky + th2, kx:kx + w2c]
         for ky in range(3) for kx in range(3)], axis=0)
    p2 = p2.reshape(9 * cmid, th2 * w2c)
    a2 = jnp.dot(w2_ref[...], p2, preferred_element_type=jnp.float32)
    a2 = a2 + b2_ref[...]
    a2 = jnp.maximum(a2, 0.1 * a2)                            # (Cout, TH*W2)

    z_ref[...] = a2.astype(z_ref.dtype)                       # lane-dense store
    psum_ref[...] = jnp.sum(a2, axis=1, keepdims=True)        # SE partial sums


# --------------------------------------------------------------------------- #
# Phase 2: streaming SE scaling (gate precomputed in plain JAX)                #
# --------------------------------------------------------------------------- #
def _se_scale_kernel(s_ref, z_ref, o_ref):
    """Pure streaming scale: o = z * s.

      s : (Cout, 1)      f32   precomputed sigmoid SE gate for this batch
      z : (Cout, CHUNK)  bf16  pre-SE activations
      o : (Cout, CHUNK)  f32   final output chunk
    """
    o_ref[...] = (z_ref[...].astype(jnp.float32) * s_ref[...]).astype(o_ref.dtype)


# --------------------------------------------------------------------------- #
# Tiling helpers + wrapper                                                     #
# --------------------------------------------------------------------------- #
def _choose_row_tile(h2, w2, max_tile_elems, min_tiles=1):
    """Pick the output-row tile height TH.

    Valid TH: divides H2 and TH*W2 is a multiple of 128 lanes (lane-dense flat
    z block), or TH == H2 (full-dim block, no constraint).  Prefers the
    largest valid tile within the element budget that still yields at least
    `min_tiles` tiles (v7x megacore utilisation when B == 1)."""
    cands = [th for th in range(1, h2 + 1)
             if h2 % th == 0 and ((th * w2) % 128 == 0 or th == h2)]
    fitting = [th for th in cands if th * w2 <= max_tile_elems]
    preferred = [th for th in fitting if h2 // th >= min_tiles]
    if preferred:
        return max(preferred)
    if fitting:
        return max(fitting)
    return min(cands)   # nothing fits the budget: smallest valid tile


def _choose_se_chunk(hw2, max_chunk):
    """Largest lane-dense chunk of the flattened spatial axis."""
    if hw2 <= max_chunk:
        return hw2
    best = 0
    for c in range(128, max_chunk + 1, 128):
        if hw2 % c == 0:
            best = c
    if best:
        return best
    # No exact 128-aligned divisor: ragged last block (Pallas masks the
    # out-of-range portion of the final block).
    return max(128, (max_chunk // 128) * 128)


def _phase1_vmem_limit(cin, cmid, cout, w, th):
    """Honest VMEM working-set estimate for one phase-1 grid step."""
    th_in, th1 = th + 4, th + 2
    w1c, w2c = w - 2, w - 4
    n1, n2 = th1 * w1c, th * w2c
    est = (2 * cin * th_in * w * 2            # double-buffered bf16 input tile
           + 9 * cin * n1 * 2                 # conv1 im2col patch (bf16)
           + cmid * n1 * (4 + 2)              # conv1 f32 acc + bf16 copy
           + 9 * cmid * n2 * 2                # conv2 im2col patch (bf16)
           + cout * n2 * 4                    # conv2 f32 acc
           + 2 * cout * n2 * 2                # double-buffered bf16 z block
           + 2 * (9 * cin * cmid + 9 * cmid * cout) * 2)   # weights
    # Headroom for compiler scratch; capped so the defaults stay well under
    # v7x's 64 MiB physical VMEM (v5e/v6e have 128 MiB).
    return int(min(max(est * 1.4, 16 * 2**20), 44 * 2**20))


def _phase2_vmem_limit(cout, chunk):
    est = 2 * cout * chunk * (2 + 4)          # double-buffered bf16-in / f32-out
    return int(min(max(est * 1.4, 8 * 2**20), 40 * 2**20))


def unet_conv_pallas(x, params, *, max_tile_elems=16384, se_chunk=16384):
    """UNetConv forward.  x: (B, Cin, H, W) float32 (NCHW, like the PyTorch
    module).  Returns (B, Cout, H-4, W-4) float32."""
    w1, b1, w2, b2, sw1, sb1, sw2, sb2 = params
    B, Cin, H, W = x.shape
    Cmid, Cout = w1.shape[0], w2.shape[0]
    H2, W2 = H - 4, W - 4
    HW2 = H2 * W2

    # Row tiling (prefer >= 2 tiles when B == 1 so both v7x cores get work).
    th = _choose_row_tile(H2, W2, max_tile_elems, min_tiles=2 if B == 1 else 1)
    T = H2 // th
    th_in = th + 4

    # Pre-slice the bf16 input into overlapping halo tiles (B, T, Cin, TH+4, W).
    # BlockSpec auto-pipelining then double-buffers the halo DMA (fetch of tile
    # t+1 overlaps the conv compute on tile t), replacing the previous
    # serialized in-kernel start()/wait() copy.  The 4-row halo duplication is
    # tiny relative to the Cout-channel activation traffic.
    xb = x.astype(jnp.bfloat16)
    x_tiles = jnp.stack(
        [lax.slice_in_dim(xb, t * th, t * th + th_in, axis=2) for t in range(T)],
        axis=1)

    z_flat, psum = pl.pallas_call(
        _conv_stack_kernel,
        out_shape=(
            jax.ShapeDtypeStruct((B, Cout, HW2), jnp.bfloat16),
            jax.ShapeDtypeStruct((B, T, Cout, 1), jnp.float32),
        ),
        grid=(B, T),
        in_specs=[
            pl.BlockSpec((None, None, Cin, th_in, W), lambda b, t: (b, t, 0, 0, 0)),
            pl.BlockSpec(w1.shape, lambda b, t: (0, 0)),
            pl.BlockSpec(b1.shape, lambda b, t: (0, 0)),
            pl.BlockSpec(w2.shape, lambda b, t: (0, 0)),
            pl.BlockSpec(b2.shape, lambda b, t: (0, 0)),
        ],
        out_specs=(
            pl.BlockSpec((None, Cout, th * W2), lambda b, t: (b, 0, t)),
            pl.BlockSpec((None, None, Cout, 1), lambda b, t: (b, t, 0, 0)),
        ),
        compiler_params=pltpu.CompilerParams(
            dimension_semantics=("parallel", "parallel"),
            vmem_limit_bytes=_phase1_vmem_limit(Cin, Cmid, Cout, W, th),
        ),
    )(x_tiles, w1, b1, w2, b2)

    # SE gate: the global mean over H2 x W2 spans all row tiles, so reduce the
    # tiny per-tile partial sums and run the two 1x1 convs + sigmoid once in
    # plain JAX ((B, Cout) sized) instead of redoing the MLP in every chunk.
    mean = psum.sum(axis=1)[..., 0] * (1.0 / HW2)                 # (B, Cout) f32
    hid = jnp.maximum(mean @ sw1.T + sb1[:, 0], 0.0)              # (B, Cr)
    gate = jax.nn.sigmoid(hid @ sw2.T + sb2[:, 0])                # (B, Cout)
    gate = gate[:, :, None].astype(jnp.float32)                   # (B, Cout, 1)

    # Phase 2: lane-dense streaming scale over large flat-spatial chunks.
    chunk = _choose_se_chunk(HW2, se_chunk)
    n_chunks = pl.cdiv(HW2, chunk)

    out_flat = pl.pallas_call(
        _se_scale_kernel,
        out_shape=jax.ShapeDtypeStruct((B, Cout, HW2), x.dtype),
        grid=(B, n_chunks),
        in_specs=[
            pl.BlockSpec((None, Cout, 1), lambda b, c: (b, 0, 0)),
            pl.BlockSpec((None, Cout, chunk), lambda b, c: (b, 0, c)),
        ],
        out_specs=pl.BlockSpec((None, Cout, chunk), lambda b, c: (b, 0, c)),
        compiler_params=pltpu.CompilerParams(
            dimension_semantics=("parallel", "parallel"),
            vmem_limit_bytes=_phase2_vmem_limit(Cout, chunk),
        ),
    )(gate, z_flat)

    # Metadata-only reshape back to NCHW (no transpose, no extra HBM pass).
    return out_flat.reshape(B, Cout, H2, W2)


# --------------------------------------------------------------------------- #
# Parameters + pure-JAX reference                                              #
# --------------------------------------------------------------------------- #
def make_params(key, in_channels, mid_channels, out_channels, reduction=8):
    """Synthetic parameters shaped like the PyTorch module, plus the
    matmul-friendly layouts the kernels expect."""
    ks = jax.random.split(key, 8)
    cr = out_channels // reduction

    conv1_w = jax.random.normal(ks[0], (mid_channels, in_channels, 3, 3), jnp.float32) * 0.1
    conv1_b = jax.random.normal(ks[1], (mid_channels,), jnp.float32) * 0.1
    conv2_w = jax.random.normal(ks[2], (out_channels, mid_channels, 3, 3), jnp.float32) * 0.1
    conv2_b = jax.random.normal(ks[3], (out_channels,), jnp.float32) * 0.1
    se1_w = jax.random.normal(ks[4], (cr, out_channels, 1, 1), jnp.float32) * 0.1
    se1_b = jax.random.normal(ks[5], (cr,), jnp.float32) * 0.1
    se2_w = jax.random.normal(ks[6], (out_channels, cr, 1, 1), jnp.float32) * 0.1
    se2_b = jax.random.normal(ks[7], (out_channels,), jnp.float32) * 0.1

    torch_params = (conv1_w, conv1_b, conv2_w, conv2_b, se1_w, se1_b, se2_w, se2_b)

    # Kernel layouts: 3x3 conv weight (O, I, kh, kw) -> (O, kh*kw*I), bf16 (MXU).
    w1 = jnp.transpose(conv1_w, (0, 2, 3, 1)).reshape(mid_channels, 9 * in_channels)
    w2 = jnp.transpose(conv2_w, (0, 2, 3, 1)).reshape(out_channels, 9 * mid_channels)
    kernel_params = (
        w1.astype(jnp.bfloat16),
        conv1_b.reshape(mid_channels, 1),
        w2.astype(jnp.bfloat16),
        conv2_b.reshape(out_channels, 1),
        se1_w.reshape(cr, out_channels),          # 1x1 conv as (Cr, Cout) matmul
        se1_b.reshape(cr, 1),
        se2_w.reshape(out_channels, cr),
        se2_b.reshape(out_channels, 1),
    )
    return torch_params, kernel_params


def unet_conv_reference(x_nchw, torch_params):
    """Plain-JAX reference mirroring the PyTorch forward (NCHW, f32)."""
    conv1_w, conv1_b, conv2_w, conv2_b, se1_w, se1_b, se2_w, se2_b = torch_params
    dn = ("NCHW", "OIHW", "NCHW")

    def leaky(v):
        return jnp.where(v >= 0, v, 0.1 * v)

    z = lax.conv_general_dilated(x_nchw, conv1_w, (1, 1), "VALID",
                                 dimension_numbers=dn) + conv1_b[None, :, None, None]
    z = leaky(z)
    z = lax.conv_general_dilated(z, conv2_w, (1, 1), "VALID",
                                 dimension_numbers=dn) + conv2_b[None, :, None, None]
    z = leaky(z)
    p = jnp.mean(z, axis=(2, 3), keepdims=True)
    p = lax.conv_general_dilated(p, se1_w, (1, 1), "VALID",
                                 dimension_numbers=dn) + se1_b[None, :, None, None]
    p = jnp.maximum(p, 0.0)
    p = lax.conv_general_dilated(p, se2_w, (1, 1), "VALID",
                                 dimension_numbers=dn) + se2_b[None, :, None, None]
    p = jax.nn.sigmoid(p)
    return z * p


if __name__ == "__main__":
    key = jax.random.PRNGKey(0)

    # --- Case 1: small requested shapes (single row tile / single chunk) ---
    B, Cin, Cmid, Cout, H, Wd = 2, 4, 8, 16, 16, 16
    k1, k2, key = jax.random.split(key, 3)
    x = jax.random.normal(k1, (B, Cin, H, Wd), jnp.float32)
    torch_p, kern_p = make_params(k2, Cin, Cmid, Cout, reduction=8)

    run = jax.jit(functools.partial(unet_conv_pallas, params=kern_p))
    out = jax.block_until_ready(run(x))
    ref = jax.block_until_ready(unet_conv_reference(x, torch_p))
    np.testing.assert_allclose(np.asarray(out), np.asarray(ref), rtol=5e-2, atol=5e-2)
    assert out.shape == (B, Cout, H - 4, Wd - 4)

    # --- Case 2: larger frame / realistic channels -> exercises the row-tiled
    #     halo path (multiple tiles, B=1 megacore split) and the chunked
    #     phase-2 streaming path. ---
    B2, Cin2, Cmid2, Cout2, Hs, Ws = 1, 3, 32, 64, 68, 68
    k3, k4, key = jax.random.split(key, 3)
    x2 = jax.random.normal(k3, (B2, Cin2, Hs, Ws), jnp.float32)
    torch_p2, kern_p2 = make_params(k4, Cin2, Cmid2, Cout2, reduction=8)

    run2 = jax.jit(functools.partial(unet_conv_pallas, params=kern_p2,
                                     max_tile_elems=1024, se_chunk=1024))
    out2 = jax.block_until_ready(run2(x2))
    ref2 = jax.block_until_ready(unet_conv_reference(x2, torch_p2))
    np.testing.assert_allclose(np.asarray(out2), np.asarray(ref2), rtol=5e-2, atol=5e-2)
    assert out2.shape == (B2, Cout2, Hs - 4, Ws - 4)

    print("KERNEL_OK")
</pallas_src>

<mosaic_0001>
module attributes {stable_mosaic.version = 11 : i64} {
  func.func @_conv_stack_kernel(%arg0: i32, %arg1: i32, %arg2: memref<1x1x4x16x16xbf16, #tpu.memory_space<vmem>>, %arg3: memref<8x36xbf16, #tpu.memory_space<vmem>>, %arg4: memref<8x1xf32, #tpu.memory_space<vmem>>, %arg5: memref<16x72xbf16, #tpu.memory_space<vmem>>, %arg6: memref<16x1xf32, #tpu.memory_space<vmem>>, %arg7: memref<1x16x144xbf16, #tpu.memory_space<vmem>>, %arg8: memref<1x1x16x1xf32, #tpu.memory_space<vmem>>) attributes {dimension_semantics = [#tpu.dimension_semantics<parallel>, #tpu.dimension_semantics<parallel>], iteration_bounds = array<i64: 2, 1>, scalar_prefetch = 0 : i64, scratch_operands = 0 : i64, tpu.core_type = #tpu.core_type<tc>, window_params = [{transform_indices = @transform_0, window_bounds = array<i64: 1, 1, 4, 16, 16>}, {pipeline_mode = #tpu.pipeline_mode<synchronous>, transform_indices = @transform_1, window_bounds = array<i64: 8, 36>}, {pipeline_mode = #tpu.pipeline_mode<synchronous>, transform_indices = @transform_2, window_bounds = array<i64: 8, 1>}, {pipeline_mode = #tpu.pipeline_mode<synchronous>, transform_indices = @transform_3, window_bounds = array<i64: 16, 72>}, {pipeline_mode = #tpu.pipeline_mode<synchronous>, transform_indices = @transform_4, window_bounds = array<i64: 16, 1>}, {transform_indices = @transform_5, window_bounds = array<i64: 1, 16, 144>}, {transform_indices = @transform_6, window_bounds = array<i64: 1, 1, 16, 1>}]} {
    %c0 = arith.constant 0 : index
    %c0_0 = arith.constant 0 : index
    %c0_1 = arith.constant 0 : index
    %c0_2 = arith.constant 0 : index
    %c0_3 = arith.constant 0 : index
    %0 = vector.load %arg2[%c0, %c0_0, %c0_1, %c0_2, %c0_3] : memref<1x1x4x16x16xbf16, #tpu.memory_space<vmem>>, vector<1x1x4x16x16xbf16>
    %1 = vector.shape_cast %0 : vector<1x1x4x16x16xbf16> to vector<4x16x16xbf16>
    %2 = vector.extract_strided_slice %1 {offsets = [0, 0, 0], sizes = [4, 14, 14], strides = [1, 1, 1]} : vector<4x16x16xbf16> to vector<4x14x14xbf16>
    %3 = vector.extract_strided_slice %1 {offsets = [0, 0, 1], sizes = [4, 14, 14], strides = [1, 1, 1]} : vector<4x16x16xbf16> to vector<4x14x14xbf16>
    %4 = vector.extract_strided_slice %1 {offsets = [0, 0, 2], sizes = [4, 14, 14], strides = [1, 1, 1]} : vector<4x16x16xbf16> to vector<4x14x14xbf16>
    %5 = vector.extract_strided_slice %1 {offsets = [0, 1, 0], sizes = [4, 14, 14], strides = [1, 1, 1]} : vector<4x16x16xbf16> to vector<4x14x14xbf16>
    %6 = vector.extract_strided_slice %1 {offsets = [0, 1, 1], sizes = [4, 14, 14], strides = [1, 1, 1]} : vector<4x16x16xbf16> to vector<4x14x14xbf16>
    %7 = vector.extract_strided_slice %1 {offsets = [0, 1, 2], sizes = [4, 14, 14], strides = [1, 1, 1]} : vector<4x16x16xbf16> to vector<4x14x14xbf16>
    %8 = vector.extract_strided_slice %1 {offsets = [0, 2, 0], sizes = [4, 14, 14], strides = [1, 1, 1]} : vector<4x16x16xbf16> to vector<4x14x14xbf16>
    %9 = vector.extract_strided_slice %1 {offsets = [0, 2, 1], sizes = [4, 14, 14], strides = [1, 1, 1]} : vector<4x16x16xbf16> to vector<4x14x14xbf16>
    %10 = vector.extract_strided_slice %1 {offsets = [0, 2, 2], sizes = [4, 14, 14], strides = [1, 1, 1]} : vector<4x16x16xbf16> to vector<4x14x14xbf16>
    %11 = tpu.concatenate %2, %3, %4, %5, %6, %7, %8, %9, %10 in 0 : vector<4x14x14xbf16>, vector<4x14x14xbf16>, vector<4x14x14xbf16>, vector<4x14x14xbf16>, vector<4x14x14xbf16>, vector<4x14x14xbf16>, vector<4x14x14xbf16>, vector<4x14x14xbf16>, vector<4x14x14xbf16> -> vector<36x14x14xbf16>
    %12 = vector.shape_cast %11 : vector<36x14x14xbf16> to vector<36x196xbf16>
    %c0_4 = arith.constant 0 : index
    %c0_5 = arith.constant 0 : index
    %13 = vector.load %arg3[%c0_4, %c0_5] : memref<8x36xbf16, #tpu.memory_space<vmem>>, vector<8x36xbf16>
    %cst = arith.constant dense<0.000000e+00> : vector<8x196xf32>
    %14 = tpu.matmul %13, %12, %cst {dimension_numbers = #tpu.dot_dimension_numbers<[1], [0], [0], [1], [0, 0, 1, 1], [], []>} : vector<8x36xbf16>, vector<36x196xbf16>, vector<8x196xf32> -> vector<8x196xf32>
    %c0_6 = arith.constant 0 : index
    %c0_7 = arith.constant 0 : index
    %15 = vector.load %arg4[%c0_6, %c0_7] : memref<8x1xf32, #tpu.memory_space<vmem>>, vector<8x1xf32>
    %16 = vector.broadcast %15 : vector<8x1xf32> to vector<8x196xf32>
    %17 = arith.addf %14, %16 : vector<8x196xf32>
    %cst_8 = arith.constant 1.000000e-01 : f32
    %18 = vector.broadcast %cst_8 : f32 to vector<8x196xf32>
    %19 = arith.mulf %18, %17 : vector<8x196xf32>
    %20 = arith.maximumf %17, %19 : vector<8x196xf32>
    %21 = arith.truncf %20 : vector<8x196xf32> to vector<8x196xbf16>
    %22 = vector.shape_cast %21 : vector<8x196xbf16> to vector<8x14x14xbf16>
    %23 = vector.extract_strided_slice %22 {offsets = [0, 0, 0], sizes = [8, 12, 12], strides = [1, 1, 1]} : vector<8x14x14xbf16> to vector<8x12x12xbf16>
    %24 = vector.extract_strided_slice %22 {offsets = [0, 0, 1], sizes = [8, 12, 12], strides = [1, 1, 1]} : vector<8x14x14xbf16> to vector<8x12x12xbf16>
    %25 = vector.extract_strided_slice %22 {offsets = [0, 0, 2], sizes = [8, 12, 12], strides = [1, 1, 1]} : vector<8x14x14xbf16> to vector<8x12x12xbf16>
    %26 = vector.extract_strided_slice %22 {offsets = [0, 1, 0], sizes = [8, 12, 12], strides = [1, 1, 1]} : vector<8x14x14xbf16> to vector<8x12x12xbf16>
    %27 = vector.extract_strided_slice %22 {offsets = [0, 1, 1], sizes = [8, 12, 12], strides = [1, 1, 1]} : vector<8x14x14xbf16> to vector<8x12x12xbf16>
    %28 = vector.extract_strided_slice %22 {offsets = [0, 1, 2], sizes = [8, 12, 12], strides = [1, 1, 1]} : vector<8x14x14xbf16> to vector<8x12x12xbf16>
    %29 = vector.extract_strided_slice %22 {offsets = [0, 2, 0], sizes = [8, 12, 12], strides = [1, 1, 1]} : vector<8x14x14xbf16> to vector<8x12x12xbf16>
    %30 = vector.extract_strided_slice %22 {offsets = [0, 2, 1], sizes = [8, 12, 12], strides = [1, 1, 1]} : vector<8x14x14xbf16> to vector<8x12x12xbf16>
    %31 = vector.extract_strided_slice %22 {offsets = [0, 2, 2], sizes = [8, 12, 12], strides = [1, 1, 1]} : vector<8x14x14xbf16> to vector<8x12x12xbf16>
    %32 = tpu.concatenate %23, %24, %25, %26, %27, %28, %29, %30, %31 in 0 : vector<8x12x12xbf16>, vector<8x12x12xbf16>, vector<8x12x12xbf16>, vector<8x12x12xbf16>, vector<8x12x12xbf16>, vector<8x12x12xbf16>, vector<8x12x12xbf16>, vector<8x12x12xbf16>, vector<8x12x12xbf16> -> vector<72x12x12xbf16>
    %33 = vector.shape_cast %32 : vector<72x12x12xbf16> to vector<72x144xbf16>
    %c0_9 = arith.constant 0 : index
    %c0_10 = arith.constant 0 : index
    %34 = vector.load %arg5[%c0_9, %c0_10] : memref<16x72xbf16, #tpu.memory_space<vmem>>, vector<16x72xbf16>
    %cst_11 = arith.constant dense<0.000000e+00> : vector<16x144xf32>
    %35 = tpu.matmul %34, %33, %cst_11 {dimension_numbers = #tpu.dot_dimension_numbers<[1], [0], [0], [1], [0, 0, 1, 1], [], []>} : vector<16x72xbf16>, vector<72x144xbf16>, vector<16x144xf32> -> vector<16x144xf32>
    %c0_12 = arith.constant 0 : index
    %c0_13 = arith.constant 0 : index
    %36 = vector.load %arg6[%c0_12, %c0_13] : memref<16x1xf32, #tpu.memory_space<vmem>>, vector<16x1xf32>
    %37 = vector.broadcast %36 : vector<16x1xf32> to vector<16x144xf32>
    %38 = arith.addf %35, %37 : vector<16x144xf32>
    %cst_14 = arith.constant 1.000000e-01 : f32
    %39 = vector.broadcast %cst_14 : f32 to vector<16x144xf32>
    %40 = arith.mulf %39, %38 : vector<16x144xf32>
    %41 = arith.maximumf %38, %40 : vector<16x144xf32>
    %42 = arith.truncf %41 : vector<16x144xf32> to vector<16x144xbf16>
    %c0_15 = arith.constant 0 : index
    %c0_16 = arith.constant 0 : index
    %c0_17 = arith.constant 0 : index
    %43 = vector.load %arg7[%c0_15, %c0_16, %c0_17] : memref<1x16x144xbf16, #tpu.memory_space<vmem>>, vector<1x16x144xbf16>
    %44 = vector.shape_cast %43 : vector<1x16x144xbf16> to vector<16x144xbf16>
    %45 = vector.shape_cast %42 : vector<16x144xbf16> to vector<1x16x144xbf16>
    tpu.vector_store %arg7[%c0_15, %c0_16, %c0_17], %45 {strides = array<i32>} : memref<1x16x144xbf16, #tpu.memory_space<vmem>>, vector<1x16x144xbf16>,
    %cst_18 = arith.constant dense<0.000000e+00> : vector<16xf32>
    %46 = vector.multi_reduction <add>, %41, %cst_18 [1] : vector<16x144xf32> to vector<16xf32>
    %47 = vector.shape_cast %46 : vector<16xf32> to vector<16x1xf32>
    %c0_19 = arith.constant 0 : index
    %c0_20 = arith.constant 0 : index
    %c0_21 = arith.constant 0 : index
    %c0_22 = arith.constant 0 : index
    %48 = vector.load %arg8[%c0_19, %c0_20, %c0_21, %c0_22] : memref<1x1x16x1xf32, #tpu.memory_space<vmem>>, vector<1x1x16x1xf32>
    %49 = vector.shape_cast %48 : vector<1x1x16x1xf32> to vector<16x1xf32>
    %50 = vector.shape_cast %47 : vector<16x1xf32> to vector<1x1x16x1xf32>
    tpu.vector_store %arg8[%c0_19, %c0_20, %c0_21, %c0_22], %50 {strides = array<i32>} : memref<1x1x16x1xf32, #tpu.memory_space<vmem>>, vector<1x1x16x1xf32>,
    return
  }
  func.func @transform_0(%arg0: i32, %arg1: i32) -> (i32, i32, i32, i32, i32) {
    %c0_i32 = arith.constant 0 : i32
    %c0_i32_0 = arith.constant 0 : i32
    %c0_i32_1 = arith.constant 0 : i32
    %c0_i32_2 = arith.constant 0 : i32
    return %arg0, %arg1, %c0_i32, %c0_i32_0, %c0_i32_1 : i32, i32, i32, i32, i32
  }
  func.func @transform_1(%arg0: i32, %arg1: i32) -> (i32, i32) {
    %c0_i32 = arith.constant 0 : i32
    %c0_i32_0 = arith.constant 0 : i32
    %c0_i32_1 = arith.constant 0 : i32
    return %c0_i32, %c0_i32_0 : i32, i32
  }
  func.func @transform_2(%arg0: i32, %arg1: i32) -> (i32, i32) {
    %c0_i32 = arith.constant 0 : i32
    %c0_i32_0 = arith.constant 0 : i32
    %c0_i32_1 = arith.constant 0 : i32
    return %c0_i32, %c0_i32_0 : i32, i32
  }
  func.func @transform_3(%arg0: i32, %arg1: i32) -> (i32, i32) {
    %c0_i32 = arith.constant 0 : i32
    %c0_i32_0 = arith.constant 0 : i32
    %c0_i32_1 = arith.constant 0 : i32
    return %c0_i32, %c0_i32_0 : i32, i32
  }
  func.func @transform_4(%arg0: i32, %arg1: i32) -> (i32, i32) {
    %c0_i32 = arith.constant 0 : i32
    %c0_i32_0 = arith.constant 0 : i32
    %c0_i32_1 = arith.constant 0 : i32
    return %c0_i32, %c0_i32_0 : i32, i32
  }
  func.func @transform_5(%arg0: i32, %arg1: i32) -> (i32, i32, i32) {
    %c0_i32 = arith.constant 0 : i32
    %c0_i32_0 = arith.constant 0 : i32
    return %arg0, %c0_i32, %arg1 : i32, i32, i32
  }
  func.func @transform_6(%arg0: i32, %arg1: i32) -> (i32, i32, i32, i32) {
    %c0_i32 = arith.constant 0 : i32
    %c0_i32_0 = arith.constant 0 : i32
    %c0_i32_1 = arith.constant 0 : i32
    return %arg0, %arg1, %c0_i32, %c0_i32_0 : i32, i32, i32, i32
  }
}

module attributes {stable_mosaic.version = 11 : i64} {
  func.func @_se_scale_kernel(%arg0: i32, %arg1: i32, %arg2: memref<1x16x1xf32, #tpu.memory_space<vmem>>, %arg3: memref<1x16x144xbf16, #tpu.memory_space<vmem>>, %arg4: memref<1x16x144xf32, #tpu.memory_space<vmem>>) attributes {dimension_semantics = [#tpu.dimension_semantics<parallel>, #tpu.dimension_semantics<parallel>], iteration_bounds = array<i64: 2, 1>, scalar_prefetch = 0 : i64, scratch_operands = 0 : i64, tpu.core_type = #tpu.core_type<tc>, window_params = [{transform_indices = @transform_0, window_bounds = array<i64: 1, 16, 1>}, {transform_indices = @transform_1, window_bounds = array<i64: 1, 16, 144>}, {transform_indices = @transform_2, window_bounds = array<i64: 1, 16, 144>}]} {
    %c0 = arith.constant 0 : index
    %c0_0 = arith.constant 0 : index
    %c0_1 = arith.constant 0 : index
    %0 = vector.load %arg3[%c0, %c0_0, %c0_1] : memref<1x16x144xbf16, #tpu.memory_space<vmem>>, vector<1x16x144xbf16>
    %1 = vector.shape_cast %0 : vector<1x16x144xbf16> to vector<16x144xbf16>
    %2 = arith.extf %1 : vector<16x144xbf16> to vector<16x144xf32>
    %c0_2 = arith.constant 0 : index
    %c0_3 = arith.constant 0 : index
    %c0_4 = arith.constant 0 : index
    %3 = vector.load %arg2[%c0_2, %c0_3, %c0_4] : memref<1x16x1xf32, #tpu.memory_space<vmem>>, vector<1x16x1xf32>
    %4 = vector.shape_cast %3 : vector<1x16x1xf32> to vector<16x1xf32>
    %5 = vector.broadcast %4 : vector<16x1xf32> to vector<16x144xf32>
    %6 = arith.mulf %2, %5 : vector<16x144xf32>
    %c0_5 = arith.constant 0 : index
    %c0_6 = arith.constant 0 : index
    %c0_7 = arith.constant 0 : index
    %7 = vector.load %arg4[%c0_5, %c0_6, %c0_7] : memref<1x16x144xf32, #tpu.memory_space<vmem>>, vector<1x16x144xf32>
    %8 = vector.shape_cast %7 : vector<1x16x144xf32> to vector<16x144xf32>
    %9 = vector.shape_cast %6 : vector<16x144xf32> to vector<1x16x144xf32>
    tpu.vector_store %arg4[%c0_5, %c0_6, %c0_7], %9 {strides = array<i32>} : memref<1x16x144xf32, #tpu.memory_space<vmem>>, vector<1x16x144xf32>,
    return
  }
  func.func @transform_0(%arg0: i32, %arg1: i32) -> (i32, i32, i32) {
    %c0_i32 = arith.constant 0 : i32
    %c0_i32_0 = arith.constant 0 : i32
    %c0_i32_1 = arith.constant 0 : i32
    return %arg0, %c0_i32, %c0_i32_0 : i32, i32, i32
  }
  func.func @transform_1(%arg0: i32, %arg1: i32) -> (i32, i32, i32) {
    %c0_i32 = arith.constant 0 : i32
    %c0_i32_0 = arith.constant 0 : i32
    return %arg0, %c0_i32, %arg1 : i32, i32, i32
  }
  func.func @transform_2(%arg0: i32, %arg1: i32) -> (i32, i32, i32) {
    %c0_i32 = arith.constant 0 : i32
    %c0_i32_0 = arith.constant 0 : i32
    return %arg0, %c0_i32, %arg1 : i32, i32, i32
  }
}

</mosaic_0001>

<bundles_post_ra>
// kernel: unet_conv_pallas.3
= control target key start
LH: loop header
LB: loop body
LE: loop exit
PB: predicated region body
PF: predicated region fallthrough
CT: control target
= control target key end

     0   :  { %s411_s9 = smov 0   ;;  %s413_s10 = smov 0   ;;  %s447_s0 = inlined_call_operand.vmem [shape: f32[2,16,1], index: 0, kind: input, shape index: {}]   ;;  %s448_s1 = inlined_call_operand.vmem [shape: bf16[2,16,144], index: 1, kind: input, shape index: {}]   ;;  %s449_s2 = inlined_call_operand.vmem [shape: f32[2,16,144], index: 2, kind: output, shape index: {}]  }
   0x1   :  { %s415_s11 = smov 0  }
   0x2 LB: > { %s24_s12 = sadd.s32 1, %s389_s10  ;;  %p333_p0 = scmp.ge.s32.totalorder %s393_s11, 1  ;;  %s393_s11 = sphi %s415_s11, %s12_s11   ;;  %s389_s10 = sphi %s413_s10, %s451_s10   ;;  %s385_s9 = sphi %s411_s9, %s450_s9  }
   0x3   : > { %p26_p1 = scmp.ge.s32.totalorder %s24_s12, 2  ;;  %p143_p2 = scmp.lt.s32.totalorder %s393_s11, 3 }
   0x5   : > { %s453_s12 = smov (%p26_p1, %s24_s12), 0  ;;  %p144_p3 = pnand %p333_p0, %p143_p2 }
   0x6   : > { %p178_p4 = scmp.lt.s32.totalorder (!%p144_p3), %s385_s9, 1  ;;  %v395_v0 = vmov (!%p144_p3), 0   ;;  %vm226_vm0 = vcmask (!%p144_p3), 130048  }
   0x7   : > { %147 = sbr.rel (%p144_p3) target bundleno = 153 (0x99), region = 28  ;;  %370 = vset.pattern.permute.xlu0 (!%p144_p3), %v395_v0 }
   0xe   : > { %s455_s9 = smov (!%p178_p4, %s385_s9), 1 }
   0xf   : > { %s342_s13 = sshll.u32 %s455_s9, 4  ;;  %s344_s20 = sshll.u32 %s455_s9, 5 }
  0x10   : > { %s182_s16 = scalar_lea.vmem %s447_s0, %s342_s13  ;;  %s191_s19 = scalar_lea.vmem %s448_s1, %s342_s13 }
  0x11   : > { %v209_v1 = vld [vmem:[%s182_s16] sm:$0xff]  ;;  %v210_v2 = vld [vmem:[%s182_s16 + $0x8] sm:$0xff]  ;;  %s201_s23 = scalar_lea.vmem %s449_s2, %s344_s20 }
  0x12   : > { %213 = vperm.xlu0 %370, %v209_v1   ;;  %v203_v3 = vld [vmem:[%s191_s19] sm:$0xff]  ;;  %v204_v6 = vld [vmem:[%s191_s19 + $0x8] sm:$0xff] }
  0x13   : > { %v205_v4 = vunpack.c.l.bf16 %v203_v3  ;;  %v206_v5 = vunpack.c.h.bf16 %v203_v3  ;;  %v207_v10 = vunpack.c.l.bf16 %v204_v6  ;;  %v208_v11 = vunpack.c.h.bf16 %v204_v6 }
  0x16   : > { %218 = vperm.xlu0 %370, %v210_v2  }
  0x91   : > { %v214_v7 = vpop.permute.xlu0 %213 }
  0x92   : > { %v221_v8 = vmul.f32 %v214_v7, %v205_v4  ;;  %v222_v9 = vmul.f32 %v214_v7, %v206_v5 }
  0x94   : > { %225 = vst [vmem:[%s201_s23] sm:$0xff] %v221_v8  ;;  %227 = vst.msk [vmem:[%s201_s23 + $0x8] sm:$0xff] %vm226_vm0, %v222_v9 }
  0x95   : > { %v219_v12 = vpop.permute.xlu0 %218 }
  0x96   : > { %v223_v13 = vmul.f32 %v219_v12, %v207_v10  ;;  %v224_v14 = vmul.f32 %v219_v12, %v208_v11 }
  0x98   : > { %228 = vst [vmem:[%s201_s23 + $0x10] sm:$0xff] %v223_v13  ;;  %229 = vst.msk [vmem:[%s201_s23 + $0x18] sm:$0xff] %vm226_vm0, %v224_v14 }
  0x99 PF: > { %s12_s11 = sadd.s32 1, %s393_s11   ;;  %s450_s9 = smov %s389_s10 }
  0x9a   : > { %p9_p5 = scmp.ge.s32.totalorder %s12_s11, 4   ;;  %s451_s10 = smov %s453_s12 }
  0x9c   :  { %11 = sbr.rel (!%p9_p5) target bundleno = 2 (0x2), region = 61 }

// kernel: unet_conv_pallas.2
= control target key start
LH: loop header
LB: loop body
LE: loop exit
PB: predicated region body
PF: predicated region fallthrough
CT: control target
= control target key end

     0   :  { %s4214_s21 = smov 0   ;;  %s4216_s22 = smov 0   ;;  %s5939_s0 = inlined_call_operand.vmem [shape: bf16[2,1,4,16,16], index: 0, kind: input, shape index: {}]   ;;  %s5940_s1 = inlined_call_operand.vmem [shape: bf16[8,36], index: 1, kind: input, shape index: {}]   ;;  %s5941_s2 = inlined_call_operand.vmem [shape: f32[8,1], index: 2, kind: input, shape index: {}]   ;;  %s5942_s3 = inlined_call_operand.vmem [shape: bf16[16,72], index: 3, kind: input, shape index: {}]   ;;  %s5943_s4 = inlined_call_operand.vmem [shape: f32[16,1], index: 4, kind: input, shape index: {}]   ;;  %s5944_s5 = inlined_call_operand.vmem [shape: bf16[2,16,144], index: 5, kind: output, shape index: {0}]   ;;  %s5945_s6 = inlined_call_operand.vmem [shape: f32[2,1,16,1], index: 6, kind: output, shape index: {1}]  }
   0x1   :  { %s4218_s23 = smov 0  }
   0x2 LB: > { %s29_s24 = sadd.s32 1, %s4135_s22  ;;  %p3985_p0 = scmp.ge.s32.totalorder %s4139_s23, 1  ;;  %s4139_s23 = sphi %s4218_s23, %s17_s23   ;;  %s4135_s22 = sphi %s4216_s22, %s5995_s22   ;;  %s4131_s21 = sphi %s4214_s21, %s5994_s21  }
   0x3   : > { %p31_p1 = scmp.ge.s32.totalorder %s29_s24, 2  ;;  %p237_p2 = scmp.lt.s32.totalorder %s4139_s23, 3 }
   0x5   : > { %s5997_s24 = smov (%p31_p1, %s29_s24), 0  ;;  %p238_p3 = pnand %p3985_p0, %p237_p2 }
   0x7   : > { %241 = sbr.rel (%p238_p3) target bundleno = 1547 (0x60b), region = 40 }
   0xe   : > { %p284_p4 = scmp.lt.s32.totalorder %s4131_s21, 1  ;;  %v5950_v0 = vmov 0   ;;  %s4142_s29 = smov 127   ;;  %vm377_vm0 = vsmask.f32 3328  ;;  %vm512_vm3 = vcmask 1042432  }
   0xf   : > { %1799 = vmatprep.mubr.bf16.mxu0 %v5950_v0  ;;  %4114 = vset.pattern.permute.xlu1 %v5950_v0  ;;  %s4143_s30 = smov 126   ;;  %vm378_vm1 = vsmask.f32 7440  ;;  %vm513_vm4 = vcmask 1046532   ;;  %s4146_s7 = smov 56   ;;  %vm1653_vm6 = vcmask 113664  }
  0x10   : > { %s5999_s21 = smov (!%p284_p4, %s4131_s21), 1  ;;  %3791 = vmatprep.mubr.bf16.mxu1 %v5950_v0  ;;  %4115 = vset.pattern.permute.xlu0 %v5950_v0  ;;  %vm4297_vm2 = vmor %vm377_vm0, %vm378_vm1  ;;  %s4147_s8 = smov 112   ;;  %vm1663_vm7 = vcmask 228352   ;;  %vm1670_vm8 = vcmask 343040   ;;  %vm1677_vm9 = vcmask 457728   ;;  %vm1721_vm10 = vcmask 97280  }
  0x11   : > { %s4047_s25 = sshll.u32 %s5999_s21, 5  ;;  %vm4336_vm5 = vmor %vm512_vm3, %vm513_vm4  ;;  %s4148_s9 = smov 40   ;;  %vm1684_vm11 = vcmask 572416   ;;  %vm1728_vm12 = vcmask 211968   ;;  %vm1691_vm13 = vcmask 687104   ;;  %vm1698_vm14 = vcmask 801792  }
  0x12   : > { %s292_s28 = scalar_lea.vmem %s5939_s0, %s4047_s25  ;;  %s4149_s10 = smov 14   ;;  %vm1735_vm15 = vcmask 326656   ;;  %vm1705_vm0 = vcmask 916480   ;;  %vm1742_vm1 = vcmask 441344   ;;  %vm1762_vm3 = vcmask 1041408  }
  0x13   : > { %v4242_v1 = vld [vmem:[%s292_s28 + $0x10] sm:$0xf]  ;;  %v4244_v2 = vld [vmem:[%s292_s28] sm:$0xf]  ;;  %v4250_v3 = vld [vmem:[%s292_s28 + $0x18] sm:$0xf] }
  0x14   : > { %337 = vrot.lane.b32.xlu1 %v4242_v1, %s4142_s29  ;;  %329 = vrot.lane.b32.xlu0 %v4244_v2, %s4142_s29  ;;  %v4252_v4 = vld [vmem:[%s292_s28 + $0x8] sm:$0xf]  ;;  %v381_v5 = vshrl.u32 %v4244_v2, 16  ;;  %v384_v6 = vshll.u32 %v4244_v2, 16  ;;  %v4268_v7 = vld [vmem:[%s292_s28 + $0xc] sm:$0xf] }
  0x15   : > { %v4270_v8 = vld [vmem:[%s292_s28 + $0x4] sm:$0xf]  ;;  %v400_v9 = vshrl.u32 %v4252_v4, 16  ;;  %v403_v10 = vshll.u32 %v4252_v4, 16  ;;  %v4278_v11 = vld [vmem:[%s292_s28 + $0x1c] sm:$0xf] }
  0x16   : > { %v383_v12 = vrot.slane %v381_v5, 4  ;;  %v386_v13 = vrot.slane %v384_v6, 5  ;;  %v438_v14 = vshrl.u32 %v4250_v3, 16  ;;  %v441_v15 = vshll.u32 %v4250_v3, 16  ;;  %v4282_v16 = vld [vmem:[%s292_s28 + $0x14] sm:$0xf] }
  0x17   : > { %v402_v17 = vrot.slane %v400_v9, 4  ;;  %v405_v18 = vrot.slane %v403_v10, 5  ;;  %v419_v19 = vshrl.u32 %v4242_v1, 16  ;;  %v422_v20 = vshll.u32 %v4242_v1, 16  ;;  %s4150_s11 = smov 28   ;;  %s4151_s12 = smov 70  }
  0x18   : > { %341 = vrot.lane.b32.xlu1 %v4250_v3, %s4142_s29  ;;  %333 = vrot.lane.b32.xlu0 %v4252_v4, %s4142_s29  ;;  %v409_v21 = vshll.u32 %v4268_v7, 16  ;;  %v387_v22 = vor.u32 %v386_v13, %v383_v12  ;;  %v390_v23 = vshll.u32 %v4270_v8, 16  ;;  %v440_v24 = vrot.slane %v438_v14, 4  ;;  %s4152_s13 = smov 42   ;;  %s4153_s14 = smov 12  }
  0x19   : > { %v406_v25 = vor.u32 %v405_v18, %v402_v17  ;;  %v443_v26 = vrot.slane %v441_v15, 5  ;;  %v421_v27 = vrot.slane %v419_v19, 4  ;;  %v424_v28 = vrot.slane %v422_v20, 5  ;;  %s4154_s15 = smov 26   ;;  %s4155_s16 = smov 84  }
  0x1a   : > { %v411_v29 = vrot.slane %v409_v21, 5  ;;  %v388_v30 = vrot.slane %v387_v22, 4  ;;  %v392_v31 = vrot.slane %v390_v23, 5  ;;  %v447_v32 = vshll.u32 %v4278_v11, 16  ;;  %s4156_s17 = smov 98   ;;  %s4157_s18 = smov 54  }
  0x1b   : > { %v407_v34 = vrot.slane %v406_v25, 4  ;;  %v444_v35 = vor.u32 %v443_v26, %v440_v24  ;;  %v425_v36 = vor.u32 %v424_v28, %v421_v27  ;;  %v428_v37 = vshll.u32 %v4282_v16, 16  ;;  %s4158_s27 = smov 100   ;;  %s4159_s28 = smov 2  }
  0x1c   : > { %357 = vrot.lane.b32.xlu1 %v4252_v4, %s4143_s30  ;;  %353 = vrot.lane.b32.xlu0 %v4244_v2, %s4143_s30  ;;  %v4308_v38 = vsel %vm4297_vm2, %v388_v30, %v392_v31  ;;  %v449_v39 = vrot.slane %v447_v32, 5  ;;  %v3993_v46 = vrot.slane %v4252_v4, 9  ;;  %v522_v47 = vrot.slane %v4268_v7, 5  ;;  %s4170_s19 = smov 116   ;;  %s4173_s20 = smov 96  }
  0x1d   : > { %v4312_v40 = vsel %vm4297_vm2, %v407_v34, %v411_v29  ;;  %v445_v41 = vrot.slane %v444_v35, 4  ;;  %v426_v42 = vrot.slane %v425_v36, 4  ;;  %v430_v43 = vrot.slane %v428_v37, 5  ;;  %s4174_s25 = smov 120   ;;  %s4175_s26 = smov 60  }
  0x1e   : > { %v413_v49 = vshrl.u32 %v4268_v7, 16  ;;  %v394_v50 = vshrl.u32 %v4270_v8, 16  ;;  %v3992_v51 = vrot.slane %v4244_v2, 9  ;;  %v517_v52 = vrot.slane %v4270_v8, 5 }
  0x1f   : > { %v4320_v44 = vsel %vm4297_vm2, %v445_v41, %v449_v39  ;;  %v4324_v45 = vsel %vm4297_vm2, %v426_v42, %v430_v43  ;;  %v4346_v53 = vsel %vm4336_vm5, %v3993_v46, %v522_v47  ;;  %v3995_v54 = vrot.slane %v4250_v3, 9 }
  0x20   : > { %365 = vrot.lane.b32.xlu1 %v4250_v3, %s4143_s30  ;;  %361 = vrot.lane.b32.xlu0 %v4242_v1, %s4143_s30  ;;  %v415_v55 = vrot.slane %v413_v49, 4  ;;  %v396_v56 = vrot.slane %v394_v50, 4  ;;  %v451_v57 = vshrl.u32 %v4278_v11, 16  ;;  %v432_v58 = vshrl.u32 %v4282_v16, 16 }
  0x21   : > { %v4357_v59 = vsel %vm4336_vm5, %v3992_v51, %v517_v52  ;;  %v532_v60 = vrot.slane %v4278_v11, 5  ;;  %v3994_v61 = vrot.slane %v4242_v1, 9  ;;  %v527_v62 = vrot.slane %v4282_v16, 5 }
  0x22   : > { %v416_v63 = vor.u32 %v415_v55, %v411_v29  ;;  %v397_v5 = vor.u32 %v396_v56, %v392_v31  ;;  %v453_v6 = vrot.slane %v451_v57, 4  ;;  %v434_v9 = vrot.slane %v432_v58, 4 }
  0x23   : > { %v4368_v10 = vsel %vm4336_vm5, %v3995_v54, %v532_v60  ;;  %v4372_v12 = vsel %vm4336_vm5, %v3994_v61, %v527_v62  ;;  %v4402_v20 = vrot.slane %v522_v47, 4  ;;  %v4404_v21 = vrot.slane %v517_v52, 4 }
  0x24   : > { %335 = vrot.lane.b32.xlu1 %v4268_v7, %s4142_s29  ;;  %331 = vrot.lane.b32.xlu0 %v4270_v8, %s4142_s29  ;;  %v4378_v13 = vrot.slane %v416_v63, 4  ;;  %v4380_v14 = vrot.slane %v397_v5, 4  ;;  %v454_v15 = vor.u32 %v453_v6, %v449_v39  ;;  %v435_v17 = vor.u32 %v434_v9, %v430_v43 }
  0x25   : > { %v4410_v22 = vrot.slane %v532_v60, 4  ;;  %v4412_v23 = vrot.slane %v527_v62, 4  ;;  %v4144_v24 = vmov 1983009808   ;;  %v587_v26 = vlaneseq }
  0x26   : > { %v4386_v18 = vrot.slane %v454_v15, 4  ;;  %v4388_v19 = vrot.slane %v435_v17, 4  ;;  %v585_v25 = vunpack.c.l.s4 %v4144_v24  ;;  %v4145_v29 = vmov 1934713408  }
  0x27   : > { %v588_v28 = vshrl.u32 %v587_v26, 7  ;;  %v602_v30 = vunpack.c.l.s4 %v4145_v29  ;;  %vm1712_vm2 = vcmask 1031168   ;;  %vm1758_vm4 = vcmask 293888  }
  0x28   : > { %343 = vrot.lane.b32.xlu1 %v4278_v11, %s4142_s29  ;;  %339 = vrot.lane.b32.xlu0 %v4282_v16, %s4142_s29  ;;  %v586_v27 = vunpack.c.0.s8 %v585_v25  ;;  %vm1844_vm5 = vcmask 15360  }
  0x29   : > { %v603_v35 = vunpack.c.0.s8 %v602_v30 }
  0x2a   : > { %v4434_v31 = vsub.s32 %v586_v27, %v588_v28 }
  0x2b   : > { %v4440_v43 = vsub.s32 %v603_v35, %v588_v28 }
  0x2c   : > { %359 = vrot.lane.b32.xlu1 %v4268_v7, %s4143_s30  ;;  %355 = vrot.lane.b32.xlu0 %v4270_v8, %s4143_s30 }
  0x30   : > { %367 = vrot.lane.b32.xlu1 %v4278_v11, %s4143_s30  ;;  %363 = vrot.lane.b32.xlu0 %v4282_v16, %s4143_s30 }
  0x34   : > { %468 = vrot.lane.b32.xlu1 %v4312_v40, %s4142_s29  ;;  %464 = vrot.lane.b32.xlu0 %v4308_v38, %s4142_s29 }
  0x38   : > { %476 = vrot.lane.b32.xlu1 %v4320_v44, %s4142_s29  ;;  %472 = vrot.lane.b32.xlu0 %v4324_v45, %s4142_s29 }
  0x3c   : > { %492 = vrot.lane.b32.xlu1 %v4312_v40, %s4143_s30  ;;  %488 = vrot.lane.b32.xlu0 %v4308_v38, %s4143_s30 }
  0x40   : > { %500 = vrot.lane.b32.xlu1 %v4320_v44, %s4143_s30  ;;  %496 = vrot.lane.b32.xlu0 %v4324_v45, %s4143_s30 }
  0x44   : > { %547 = vrot.lane.b32.xlu1 %v4346_v53, %s4142_s29  ;;  %543 = vrot.lane.b32.xlu0 %v4357_v59, %s4142_s29 }
  0x48   : > { %555 = vrot.lane.b32.xlu1 %v4368_v10, %s4142_s29  ;;  %551 = vrot.lane.b32.xlu0 %v4372_v12, %s4142_s29 }
  0x4c   : > { %470 = vrot.lane.b32.xlu1 %v4378_v13, %s4142_s29  ;;  %466 = vrot.lane.b32.xlu0 %v4380_v14, %s4142_s29 }
  0x50   : > { %478 = vrot.lane.b32.xlu1 %v4386_v18, %s4142_s29  ;;  %474 = vrot.lane.b32.xlu0 %v4388_v19, %s4142_s29 }
  0x54   : > { %494 = vrot.lane.b32.xlu1 %v4378_v13, %s4143_s30  ;;  %490 = vrot.lane.b32.xlu0 %v4380_v14, %s4143_s30 }
  0x58   : > { %502 = vrot.lane.b32.xlu1 %v4386_v18, %s4143_s30  ;;  %498 = vrot.lane.b32.xlu0 %v4388_v19, %s4143_s30 }
  0x5c   : > { %549 = vrot.lane.b32.xlu1 %v4402_v20, %s4142_s29  ;;  %545 = vrot.lane.b32.xlu0 %v4404_v21, %s4142_s29 }
  0x60   : > { %557 = vrot.lane.b32.xlu1 %v4410_v22, %s4142_s29  ;;  %553 = vrot.lane.b32.xlu0 %v4412_v23, %s4142_s29 }
  0x64   : > { %571 = vrot.lane.b32.xlu1 %v4346_v53, %s4143_s30  ;;  %567 = vrot.lane.b32.xlu0 %v4357_v59, %s4143_s30 }
  0x68   : > { %579 = vrot.lane.b32.xlu1 %v4368_v10, %s4143_s30  ;;  %575 = vrot.lane.b32.xlu0 %v4372_v12, %s4143_s30 }
  0x6c   : > { %573 = vrot.lane.b32.xlu1 %v4402_v20, %s4143_s30  ;;  %569 = vrot.lane.b32.xlu0 %v4404_v21, %s4143_s30 }
  0x70   : > { %581 = vrot.lane.b32.xlu1 %v4410_v22, %s4143_s30  ;;  %577 = vrot.lane.b32.xlu0 %v4412_v23, %s4143_s30 }
  0x86   : > { %v338_v32 = vpop.permute.xlu1 %337  ;;  %v330_v33 = vpop.permute.xlu0 %329 }
  0x87   : > { %v591_v34 = vcombine.low %v4242_v1, %v338_v32  ;;  %v583_v36 = vcombine.low %v4244_v2, %v330_v33 }
  0x89   : > { %v598_v37 = vrot.slane %v591_v34, %v4434_v31  ;;  %v590_v39 = vrot.slane %v583_v36, %v4434_v31 }
  0x8a   : > { %v342_v41 = vpop.permute.xlu1 %341  ;;  %v334_v42 = vpop.permute.xlu0 %333 }
  0x8b   : > { %v600_v46 = vcombine.high %v590_v39, %v598_v37  ;;  %v625_v47 = vcombine.low %v4250_v3, %v342_v41  ;;  %v617_v48 = vcombine.low %v4252_v4, %v334_v42  ;;  %v599_v50 = vcombine.low %v590_v39, %v598_v37 }
  0x8d   : > { %v632_v49 = vrot.slane %v625_v47, %v4434_v31  ;;  %v624_v1 = vrot.slane %v617_v48, %v4434_v31  ;;  %v614_v52 = vrot.slane %v600_v46, %v4440_v43  ;;  %v4454_v58 = vrot.slane %v599_v50, %v4440_v43 }
  0x8e   : > { %v358_v51 = vpop.permute.xlu1 %357  ;;  %v354_v2 = vpop.permute.xlu0 %353 }
  0x8f   : > { %v633_v54 = vcombine.low %v624_v1, %v632_v49  ;;  %v634_v55 = vcombine.high %v624_v1, %v632_v49  ;;  %v685_v3 = vcombine.low %v358_v51, %v4312_v40  ;;  %v651_v4 = vcombine.low %v354_v2, %v4308_v38 }
  0x90   : > { %v1268_v5 = vshrl.u32 %v614_v52, 16  ;;  %v4459_v9 = vcombine.high %v614_v52, %v5950_v0 }
  0x91   : > { %v4448_v56 = vrot.slane %v633_v54, %v4440_v43  ;;  %v648_v57 = vrot.slane %v634_v55, %v4440_v43  ;;  %v692_v40 = vrot.slane %v685_v3, %v4434_v31  ;;  %v658_v17 = vrot.slane %v651_v4, %v4434_v31 }
  0x92   : > { %v366_v60 = vpop.permute.xlu1 %365  ;;  %v362_v61 = vpop.permute.xlu0 %361  ;;  %v1274_v34 = vshrl.u32 %v4459_v9, 16 }
  0x93   : > { %v693_v62 = vcombine.low %v366_v60, %v4320_v44  ;;  %v659_v63 = vcombine.low %v362_v61, %v4324_v45  ;;  %v1269_v6 = vshrl.u32 %v648_v57, 16  ;;  %v4462_v15 = vcombine.high %v648_v57, %v5950_v0 }
  0x94   : > { %v1255_v38 = vpack.i.b16 %v4448_v56, %v4454_v58  ;;  %v1267_v1 = vpack.i.b16 %v648_v57, %v614_v52 }
  0x95   : > { %v700_v24 = vrot.slane %v693_v62, %v4434_v31  ;;  %v666_v44 = vrot.slane %v659_v63, %v4434_v31  ;;  %v4470_v26 = vpack.i.b16 %v1269_v6, %v1268_v5  ;;  %v1273_v27 = vpack.i.b16 %v4462_v15, %v4459_v9 }
  0x96   : > { %v336_v45 = vpop.permute.xlu1 %335  ;;  %v332_v25 = vpop.permute.xlu0 %331  ;;  %v1275_v35 = vshrl.u32 %v4462_v15, 16 }
  0x97   : > { %v701_v28 = vcombine.low %v692_v40, %v700_v24  ;;  %v702_v29 = vcombine.high %v692_v40, %v700_v24  ;;  %v667_v30 = vcombine.low %v658_v17, %v666_v44  ;;  %v668_v32 = vcombine.high %v658_v17, %v666_v44 }
  0x98   : > { %v956_v33 = vcombine.low %v4268_v7, %v336_v45  ;;  %v923_v39 = vcombine.low %v4270_v8, %v332_v25  ;;  %v4486_v48 = vpack.i.b16 %v1275_v35, %v1274_v34 }
  0x99   : > { %v716_v36 = vrot.slane %v702_v29, %v4440_v43  ;;  %v682_v37 = vrot.slane %v668_v32, %v4440_v43  ;;  %v4481_v41 = vrot.slane %v701_v28, %v4440_v43  ;;  %v4484_v42 = vrot.slane %v667_v30, %v4440_v43 }
  0x9a   : > { %v344_v46 = vpop.permute.xlu1 %343  ;;  %v340_v47 = vpop.permute.xlu0 %339  ;;  %v963_v51 = vrot.slane %v956_v33, %v4434_v31  ;;  %v930_v8 = vrot.slane %v923_v39, %v4434_v31  ;;  %v1256_v28 = vshrl.u32 %v4454_v58, 16 }
  0x9b   : > { %v964_v7 = vcombine.low %v4278_v11, %v344_v46  ;;  %v931_v49 = vcombine.low %v4282_v16, %v340_v47  ;;  %v1309_v50 = vpack.i.b16 %v716_v36, %v682_v37  ;;  %v1298_v60 = vshrl.u32 %v4484_v42, 16 }
  0x9c   : > { %v1299_v61 = vshrl.u32 %v4481_v41, 16  ;;  %v1310_v11 = vshrl.u32 %v682_v37, 16  ;;  %v1311_v62 = vshrl.u32 %v716_v36, 16 }
  0x9d   : > { %v971_v2 = vrot.slane %v964_v7, %v4434_v31  ;;  %v938_v54 = vrot.slane %v931_v49, %v4434_v31  ;;  %v4008_v55 = vcombine.low %v1267_v1, %v1309_v50 }
  0x9e   : > { %v360_v3 = vpop.permute.xlu1 %359  ;;  %v356_v4 = vpop.permute.xlu0 %355  ;;  %v4513_v29 = vpack.i.b16 %v1311_v62, %v1310_v11  ;;  %v4518_v33 = vpack.i.b16 %v1299_v61, %v1298_v60 }
  0x9f   : > { %v972_v16 = vcombine.low %v963_v51, %v971_v2  ;;  %v973_v52 = vcombine.high %v963_v51, %v971_v2  ;;  %v939_v57 = vcombine.low %v930_v8, %v938_v54  ;;  %v940_v63 = vcombine.high %v930_v8, %v938_v54  ;;  %1521 = vrot.lane.b32.xlu1 %v4008_v55, %s4146_s7 }
  0xa0   : > { %v1022_v5 = vcombine.low %v360_v3, %v4378_v13  ;;  %v989_v6 = vcombine.low %v356_v4, %v4380_v14  ;;  %v1257_v13 = vshrl.u32 %v4448_v56, 16  ;;  %v684_v8 = vcombine.high %v682_v37, %v5950_v0 }
  0xa1   : > { %v4500_v40 = vrot.slane %v972_v16, %v4440_v43  ;;  %v4503_v17 = vrot.slane %v973_v52, %v4440_v43  ;;  %v4506_v24 = vrot.slane %v939_v57, %v4440_v43  ;;  %v4509_v44 = vrot.slane %v940_v63, %v4440_v43 }
  0xa2   : > { %v368_v45 = vpop.permute.xlu1 %367  ;;  %v364_v25 = vpop.permute.xlu0 %363  ;;  %v1029_v14 = vrot.slane %v1022_v5, %v4434_v31  ;;  %v996_v34 = vrot.slane %v989_v6, %v4434_v31  ;;  %v718_v2 = vcombine.high %v716_v36, %v5950_v0 }
  0xa3   : > { %v1030_v30 = vcombine.low %v368_v45, %v4386_v18  ;;  %v997_v32 = vcombine.low %v364_v25, %v4388_v19  ;;  %v1279_v35 = vpack.i.b16 %v4500_v40, %v4506_v24  ;;  %v1291_v39 = vpack.i.b16 %v4503_v17, %v4509_v44 }
  0xa4   : > { %v948_v18 = vcombine.high %v4506_v24, %v5950_v0  ;;  %v981_v19 = vcombine.high %v4500_v40, %v5950_v0  ;;  %v1280_v50 = vshrl.u32 %v4506_v24, 16  ;;  %v1281_v51 = vshrl.u32 %v4500_v40, 16 }
  0xa5   : > { %v1037_v47 = vrot.slane %v1030_v30, %v4434_v31  ;;  %v1004_v7 = vrot.slane %v997_v32, %v4434_v31  ;;  %v1315_v62 = vpack.i.b16 %v718_v2, %v684_v8  ;;  %v1316_v40 = vshrl.u32 %v684_v8, 16 }
  0xa6   : > { %v4533_v49 = vpop.permute.xlu1 %468  ;;  %v4535_v1 = vpop.permute.xlu0 %464  ;;  %v1285_v60 = vpack.i.b16 %v981_v19, %v948_v18  ;;  %v1286_v61 = vshrl.u32 %v948_v18, 16  ;;  %v1287_v11 = vshrl.u32 %v981_v19, 16  ;;  %v1317_v24 = vshrl.u32 %v718_v2, 16 }
  0xa7   : > { %v1038_v54 = vcombine.low %v1029_v14, %v1037_v47  ;;  %v1039_v55 = vcombine.high %v1029_v14, %v1037_v47  ;;  %v1005_v3 = vcombine.low %v996_v34, %v1004_v7  ;;  %v1006_v4 = vcombine.high %v996_v34, %v1004_v7 }
  0xa8   : > { %v4545_v6 = vpack.i.b16 %v1287_v11, %v1286_v61  ;;  %v4550_v36 = vcombine.low %v1273_v27, %v1315_v62  ;;  %v1292_v30 = vshrl.u32 %v4509_v44, 16  ;;  %v4555_v47 = vpack.i.b16 %v1317_v24, %v1316_v40 }
  0xa9   : > { %v1046_v16 = vrot.slane %v1038_v54, %v4440_v43  ;;  %v1054_v52 = vrot.slane %v1039_v55, %v4440_v43  ;;  %v1013_v57 = vrot.slane %v1005_v3, %v4440_v43  ;;  %v1021_v63 = vrot.slane %v1006_v4, %v4440_v43 }
  0xaa   : > { %v477_v5 = vpop.permute.xlu1 %476  ;;  %v473_v37 = vpop.permute.xlu0 %472  ;;  %v1293_v7 = vshrl.u32 %v4503_v17, 16  ;;  %v1258_v3 = vpack.i.b16 %v1257_v13, %v1256_v28  ;;  %v1282_v40 = vpack.i.b16 %v1281_v51, %v1280_v50 }
  0xab   : > { %v1321_v45 = vpack.i.b16 %v1046_v16, %v1013_v57  ;;  %v1333_v25 = vpack.i.b16 %v1054_v52, %v1021_v63  ;;  %v1322_v14 = vshrl.u32 %v1013_v57, 16  ;;  %v1014_v32 = vcombine.high %v1013_v57, %v5950_v0 }
  0xac   : > { %v1047_v34 = vcombine.high %v1046_v16, %v5950_v0  ;;  %v1323_v9 = vshrl.u32 %v1046_v16, 16  ;;  %v1334_v15 = vshrl.u32 %v1021_v63, 16  ;;  %v1335_v17 = vshrl.u32 %v1054_v52, 16 }
  0xad   : > { %v4020_v18 = vcombine.low %v1279_v35, %v1321_v45  ;;  %v4032_v19 = vcombine.low %v1291_v39, %v1333_v25  ;;  %v1328_v54 = vshrl.u32 %v1014_v32, 16  ;;  %v4566_v4 = vpack.i.b16 %v1293_v7, %v1292_v30 }
  0xae   : > { %v493_v27 = vpop.permute.xlu1 %492  ;;  %v489_v8 = vpop.permute.xlu0 %488  ;;  %v1327_v2 = vpack.i.b16 %v1047_v34, %v1014_v32  ;;  %v1329_v55 = vshrl.u32 %v1047_v34, 16  ;;  %v3999_v61 = vcombine.low %v1258_v3, %v4518_v33  ;;  %v1324_v11 = vpack.i.b16 %v1323_v9, %v1322_v14 }
  0xaf   : > { %1577 = vrot.lane.b32.xlu0 %v4020_v18, %s4147_s8  ;;  %1633 = vrot.lane.b32.xlu1 %v4032_v19, %s4148_s9  ;;  %v4569_v62 = vpack.i.b16 %v1335_v17, %v1334_v15  ;;  %v1297_v16 = vpack.i.b16 %v4481_v41, %v4484_v42  ;;  %v753_v24 = vcombine.low %v4533_v49, %v493_v27 }
  0xb0   : > { %v4562_v35 = vcombine.low %v1285_v60, %v1327_v2  ;;  %v4564_v39 = vpack.i.b16 %v1329_v55, %v1328_v54  ;;  %v719_v50 = vcombine.low %v4535_v1, %v489_v8  ;;  %v4023_v51 = vcombine.low %v1282_v40, %v1324_v11 }
  0xb1   : > { %v4581_v52 = vcombine.low %v1255_v38, %v1297_v16  ;;  %v4593_v14 = vrot.slane %v753_v24, %v4434_v31  ;;  %v717_v33 = vcombine.high %v4481_v41, %v5950_v0 }
  0xb2   : > { %v501_v57 = vpop.permute.xlu1 %500  ;;  %v497_v63 = vpop.permute.xlu0 %496  ;;  %v4596_v38 = vrot.slane %v719_v50, %v4434_v31 }
  0xb3   : > { %v761_v13 = vcombine.low %v477_v5, %v501_v57  ;;  %v727_v60 = vcombine.low %v473_v37, %v497_v63  ;;  %1479 = vrot.lane.b32.xlu0 %v3999_v61, %s4149_s10  ;;  %5960 = vst [vmem:[#allocation2_spill] sm:$0xff] %v4581_v52 }
  0xb5   : > { %v4586_v45 = vrot.slane %v761_v13, %v4434_v31  ;;  %v4589_v5 = vrot.slane %v727_v60, %v4434_v31 }
  0xb6   : > { %v548_v37 = vpop.permute.xlu1 %547  ;;  %v544_v25 = vpop.permute.xlu0 %543 }
  0xb7   : > { %1591 = vrot.lane.b32.xlu0 %v4023_v51, %s4143_s30  ;;  %v769_v49 = vcombine.low %v4593_v14, %v4586_v45  ;;  %v735_v1 = vcombine.low %v4596_v38, %v4589_v5  ;;  %v821_v18 = vcombine.low %v4346_v53, %v548_v37  ;;  %v787_v19 = vcombine.low %v4357_v59, %v544_v25 }
  0xb9   : > { %v4607_v9 = vrot.slane %v769_v49, %v4440_v43  ;;  %v4610_v15 = vrot.slane %v735_v1, %v4440_v43  ;;  %v4623_v53 = vrot.slane %v821_v18, %v4434_v31  ;;  %v4626_v59 = vrot.slane %v787_v19, %v4434_v31 }
  0xba   : > { %v556_v30 = vpop.permute.xlu1 %555  ;;  %v552_v32 = vpop.permute.xlu0 %551 }
  0xbb   : > { %v829_v34 = vcombine.low %v4368_v10, %v556_v30  ;;  %v795_v7 = vcombine.low %v4372_v12, %v552_v32  ;;  %v1339_v17 = vpack.i.b16 %v4607_v9, %v4610_v15 }
  0xbd   : > { %v4613_v27 = vrot.slane %v829_v34, %v4434_v31  ;;  %v4616_v8 = vrot.slane %v795_v7, %v4434_v31 }
  0xbe   : > { %v4618_v2 = vpop.permute.xlu1 %470  ;;  %v4620_v10 = vpop.permute.xlu0 %466 }
  0xbf   : > { %v837_v12 = vcombine.low %v4623_v53, %v4613_v27  ;;  %v803_v54 = vcombine.low %v4626_v59, %v4616_v8 }
  0xc1   : > { %v4639_v61 = vrot.slane %v837_v12, %v4440_v43  ;;  %v4642_v11 = vrot.slane %v803_v54, %v4440_v43 }
  0xc2   : > { %v4632_v55 = vpop.permute.xlu1 %478  ;;  %v4634_v3 = vpop.permute.xlu0 %474 }
  0xc3   : > { %v1381_v13 = vpack.i.b16 %v4639_v61, %v4642_v11 }
  0xc5   : > { %v4650_v60 = vcombine.low %v1339_v17, %v1381_v13  ;;  %v683_v13 = vcombine.high %v4484_v42, %v5950_v0 }
  0xc6   : > { %v4644_v16 = vpop.permute.xlu1 %494  ;;  %v4646_v57 = vpop.permute.xlu0 %490 }
  0xc7   : > { %5961 = vst [vmem:[#allocation3_spill] sm:$0xff] %v4650_v60  ;;  %v1304_v28 = vshrl.u32 %v683_v13, 16 }
  0xca   : > { %v503_v63 = vpop.permute.xlu1 %502  ;;  %v499_v40 = vpop.permute.xlu0 %498 }
  0xce   : > { %v550_v24 = vpop.permute.xlu1 %549  ;;  %v546_v50 = vpop.permute.xlu0 %545 }
  0xd2   : > { %v558_v51 = vpop.permute.xlu1 %557  ;;  %v554_v37 = vpop.permute.xlu0 %553 }
  0xd3   : > { %v1162_v46 = vcombine.low %v4410_v22, %v558_v51  ;;  %v1129_v60 = vcombine.low %v4412_v23, %v554_v37  ;;  %v1088_v22 = vcombine.low %v4618_v2, %v4644_v16  ;;  %v1055_v37 = vcombine.low %v4620_v10, %v4646_v57 }
  0xd5   : > { %v4718_v16 = vrot.slane %v1055_v37, %v4434_v31 }
  0xd6   : > { %v572_v25 = vpop.permute.xlu1 %571  ;;  %v568_v49 = vpop.permute.xlu0 %567 }
  0xd7   : > { %v896_v32 = vrot.slane %v572_v25, %v4434_v31  ;;  %v862_v34 = vrot.slane %v568_v49, %v4434_v31 }
  0xda   : > { %v580_v1 = vpop.permute.xlu1 %579  ;;  %v576_v30 = vpop.permute.xlu0 %575 }
  0xdb   : > { %v904_v7 = vrot.slane %v580_v1, %v4434_v31  ;;  %v870_v18 = vrot.slane %v576_v30, %v4434_v31  ;;  %v649_v30 = vcombine.high %v4448_v56, %v5950_v0  ;;  %v1305_v56 = vshrl.u32 %v717_v33, 16 }
  0xdd   : > { %v905_v19 = vcombine.low %v896_v32, %v904_v7  ;;  %v906_v12 = vcombine.high %v896_v32, %v904_v7  ;;  %v871_v54 = vcombine.low %v862_v34, %v870_v18  ;;  %v872_v17 = vcombine.high %v862_v34, %v870_v18 }
  0xde   : > { %v615_v7 = vcombine.high %v4454_v58, %v5950_v0  ;;  %v1303_v18 = vpack.i.b16 %v717_v33, %v683_v13  ;;  %v1121_v33 = vcombine.low %v4404_v21, %v546_v50  ;;  %v1306_v51 = vpack.i.b16 %v1305_v56, %v1304_v28 }
  0xdf   : > { %v913_v44 = vrot.slane %v905_v19, %v4440_v43  ;;  %v4662_v25 = vrot.slane %v906_v12, %v4440_v43  ;;  %v879_v49 = vrot.slane %v871_v54, %v4440_v43  ;;  %v4666_v1 = vrot.slane %v872_v17, %v4440_v43 }
  0xe0   : > { %v1261_v17 = vpack.i.b16 %v649_v30, %v615_v7  ;;  %v1262_v23 = vshrl.u32 %v615_v7, 16  ;;  %v4695_v13 = vrot.slane %v1162_v46, %v4434_v31  ;;  %v4711_v46 = vrot.slane %v1121_v33, %v4434_v31 }
  0xe1   : > { %5962 = vst [vmem:[#allocation4_spill] sm:$0xff] %v4662_v25  ;;  %5963 = vst [vmem:[#allocation5_spill] sm:$0xff] %v4666_v1  ;;  %v1435_v32 = vpack.i.b16 %v4662_v25, %v4666_v1  ;;  %v1424_v42 = vshrl.u32 %v879_v49, 16  ;;  %v1425_v34 = vshrl.u32 %v913_v44, 16  ;;  %v4673_v41 = vcombine.high %v879_v49, %v5950_v0 }
  0xe2   : > { %v4678_v19 = vcombine.high %v913_v44, %v5950_v0  ;;  %v4002_v58 = vcombine.low %v1261_v17, %v1303_v18  ;;  %v1263_v1 = vshrl.u32 %v649_v30, 16  ;;  %v1096_v0 = vcombine.low %v4632_v55, %v503_v63 }
  0xe3   : > { %v4010_v12 = vcombine.low %v1435_v32, %v1435_v32  ;;  %v1426_v54 = vpack.i.b16 %v1425_v34, %v1424_v42  ;;  %v1063_v32 = vcombine.low %v4634_v3, %v499_v40  ;;  %v1154_v42 = vcombine.low %v4402_v20, %v550_v24 }
  0xe4   : > { %v1429_v25 = vpack.i.b16 %v4678_v19, %v4673_v41  ;;  %v4698_v55 = vrot.slane %v1129_v60, %v4434_v31  ;;  %v1264_v21 = vpack.i.b16 %v1263_v1, %v1262_v23  ;;  %v4715_v3 = vrot.slane %v1088_v22, %v4434_v31 }
  0xe5   : > { %1525 = vrot.lane.b32.xlu1 %v4010_v12, %s4146_s7  ;;  %v4001_v52 = vcombine.low %v1426_v54, %v1426_v54  ;;  %v4705_v2 = vrot.slane %v1063_v32, %v4434_v31  ;;  %v4708_v28 = vrot.slane %v1154_v42, %v4434_v31  ;;  %v5964_v63 = vcombine.low %v4470_v26, %v4513_v29 }
  0xe6   : > { %v4004_v20 = vcombine.low %v1429_v25, %v1429_v25  ;;  %v4005_v10 = vcombine.low %v1264_v21, %v1306_v51  ;;  %v1137_v57 = vcombine.low %v4711_v46, %v4698_v55  ;;  %v770_v40 = vcombine.high %v4593_v14, %v4586_v45 }
  0xe7   : > { %1483 = vrot.lane.b32.xlu0 %v4001_v52, %s4149_s10  ;;  %v4702_v52 = vrot.slane %v1096_v0, %v4434_v31  ;;  %v1170_v0 = vcombine.low %v4708_v28, %v4695_v13  ;;  %v736_v60 = vcombine.high %v4596_v38, %v4589_v5  ;;  %v838_v24 = vcombine.high %v4623_v53, %v4613_v27 }
  0xe8   : > { %v804_v50 = vcombine.high %v4626_v59, %v4616_v8  ;;  %v1071_v1 = vcombine.low %v4718_v16, %v4705_v2  ;;  %v4741_v26 = vpack.i.b16 %v913_v44, %v879_v49  ;;  %v4747_v45 = vrot.slane %v1137_v57, %v4440_v43  ;;  %v570_v57 = vpop.permute.xlu0 %569 }
  0xe9   : > { %1493 = vrot.lane.b32.xlu1 %v4002_v58, %s4150_s11  ;;  %v1104_v25 = vcombine.low %v4715_v3, %v4702_v52  ;;  %v4744_v29 = vrot.slane %v1170_v0, %v4440_v43  ;;  %v1430_v5 = vshrl.u32 %v4673_v41, 16  ;;  %v1431_v14 = vshrl.u32 %v4678_v19, 16 }
  0xea   : > { %v784_v38 = vrot.slane %v770_v40, %v4440_v43  ;;  %v750_v27 = vrot.slane %v736_v60, %v4440_v43  ;;  %v852_v44 = vrot.slane %v838_v24, %v4440_v43  ;;  %v818_v8 = vrot.slane %v804_v50, %v4440_v43 }
  0xeb   : > { %1497 = vrot.lane.b32.xlu0 %v4004_v20, %s4150_s11  ;;  %v4758_v53 = vrot.slane %v1104_v25, %v4440_v43  ;;  %v4761_v59 = vrot.slane %v1071_v1, %v4440_v43  ;;  %v1432_v49 = vpack.i.b16 %v1431_v14, %v1430_v5  ;;  %v1406_v30 = vshrl.u32 %v4747_v45, 16 }
  0xec   : > { %v1407_v34 = vshrl.u32 %v4744_v29, 16  ;;  %v1351_v41 = vpack.i.b16 %v784_v38, %v750_v27  ;;  %v1393_v7 = vpack.i.b16 %v852_v44, %v818_v8  ;;  %v1340_v18 = vshrl.u32 %v4610_v15, 16 }
  0xed   : > { %1535 = vrot.lane.b32.xlu1 %v5964_v63, %s4151_s12  ;;  %v5966_v19 = vcombine.low %v4486_v48, %v4555_v47  ;;  %v1341_v17 = vshrl.u32 %v4607_v9, 16  ;;  %v1382_v56 = vshrl.u32 %v4642_v11, 16  ;;  %v1383_v58 = vshrl.u32 %v4639_v61, 16 }
  0xee   : > { %v1352_v48 = vshrl.u32 %v750_v27, 16  ;;  %v5968_v47 = vcombine.low %v4566_v4, %v4569_v62  ;;  %v4007_v32 = vcombine.low %v1432_v49, %v1432_v49  ;;  %v1408_v42 = vpack.i.b16 %v1407_v34, %v1406_v30 }
  0xef   : > { %1507 = vrot.lane.b32.xlu0 %v4005_v10, %s4152_s13  ;;  %v1353_v23 = vshrl.u32 %v784_v38, 16  ;;  %v1394_v51 = vshrl.u32 %v818_v8, 16  ;;  %v1395_v37 = vshrl.u32 %v852_v44, 16  ;;  %v4009_v4 = vcombine.low %v1351_v41, %v1393_v7  ;;  %v574_v10 = vpop.permute.xlu1 %573 }
  0xf0   : > { %v1384_v25 = vpack.i.b16 %v1383_v58, %v1382_v56  ;;  %v1171_v58 = vcombine.high %v4708_v28, %v4695_v13 }
  0xf1   : > { %1605 = vrot.lane.b32.xlu1 %v4562_v35, %s4153_s14  ;;  %v5965_v35 = vcombine.low %v4545_v6, %v4564_v39  ;;  %v1364_v6 = vshrl.u32 %v4761_v59, 16  ;;  %v1365_v39 = vshrl.u32 %v4758_v53, 16  ;;  %v1396_v1 = vpack.i.b16 %v1395_v37, %v1394_v51 }
  0xf2   : > { %v1354_v14 = vpack.i.b16 %v1353_v23, %v1352_v48  ;;  %v1138_v48 = vcombine.high %v4711_v46, %v4698_v55  ;;  %v4845_v55 = vrot.slane %v570_v57, %v4434_v31  ;;  %v5969_v57 = vld [vmem:[#allocation5_spill] sm:$0xff] }
  0xf3   : > { %1619 = vrot.lane.b32.xlu0 %v5965_v35, %s4154_s15  ;;  %v1366_v62 = vpack.i.b16 %v1365_v39, %v1364_v6  ;;  %v582_v7 = vpop.permute.xlu1 %581  ;;  %v578_v39 = vpop.permute.xlu0 %577 }
  0xf4   : > { %v4841_v13 = vrot.slane %v582_v7, %v4434_v31  ;;  %v4848_v46 = vrot.slane %v578_v39, %v4434_v31  ;;  %v1153_v23 = vrot.slane %v1138_v48, %v4440_v43 }
  0xf5   : > { %1549 = vrot.lane.b32.xlu1 %v4550_v36, %s4155_s16  ;;  %v5967_v36 = vmov 0   ;;  %v4024_v24 = vcombine.low %v1366_v62, %v1408_v42  ;;  %v4838_v42 = vrot.slane %v574_v10, %v4434_v31 }
  0xf6   : > { %v4780_v12 = vcombine.high %v4747_v45, %v5967_v36  ;;  %v4784_v54 = vcombine.high %v4744_v29, %v5967_v36  ;;  %v4795_v33 = vcombine.high %v4761_v59, %v5967_v36  ;;  %v4799_v22 = vcombine.high %v4758_v53, %v5967_v36 }
  0xf7   : > { %1563 = vrot.lane.b32.xlu0 %v5966_v19, %s4156_s17  ;;  %v751_v20 = vcombine.high %v4610_v15, %v5967_v36  ;;  %v785_v0 = vcombine.high %v4607_v9, %v5967_v36  ;;  %v819_v63 = vcombine.high %v4642_v11, %v5967_v36  ;;  %v853_v40 = vcombine.high %v4639_v61, %v5967_v36 }
  0xf8   : > { %v1411_v21 = vpack.i.b16 %v4784_v54, %v4780_v12  ;;  %v4813_v15 = vcombine.high %v750_v27, %v5967_v36  ;;  %v786_v60 = vcombine.high %v784_v38, %v5967_v36  ;;  %v1369_v50 = vpack.i.b16 %v4799_v22, %v4795_v33 }
  0xf9   : > { %1647 = vrot.lane.b32.xlu1 %v5968_v47, %s4157_s18  ;;  %v1342_v9 = vpack.i.b16 %v1341_v17, %v1340_v18  ;;  %v820_v5 = vcombine.high %v818_v8, %v5967_v36  ;;  %v854_v11 = vcombine.high %v852_v44, %v5967_v36  ;;  %v1345_v27 = vpack.i.b16 %v785_v0, %v751_v20 }
  0xfa   : > { %v4027_v61 = vcombine.low %v1369_v50, %v1411_v21  ;;  %v1346_v35 = vshrl.u32 %v751_v20, 16  ;;  %v1387_v38 = vpack.i.b16 %v853_v40, %v819_v63  ;;  %v1357_v49 = vpack.i.b16 %v786_v60, %v4813_v15 }
  0xfb   : > { %1511 = vrot.lane.b32.xlu0 %v4007_v32, %s4152_s13  ;;  %v1347_v30 = vshrl.u32 %v785_v0, 16  ;;  %v1388_v34 = vshrl.u32 %v819_v63, 16  ;;  %v4000_v41 = vcombine.low %v1342_v9, %v1384_v25  ;;  %v1412_v18 = vshrl.u32 %v4780_v12, 16 }
  0xfc   : > { %v1413_v8 = vshrl.u32 %v4784_v54, 16  ;;  %v1389_v44 = vshrl.u32 %v853_v40, 16  ;;  %v4012_v19 = vcombine.low %v1354_v14, %v1396_v1  ;;  %v1399_v6 = vpack.i.b16 %v854_v11, %v820_v5  ;;  %v5970_v40 = vld [vmem:[#allocation4_spill] sm:$0xff] }
  0xfd   : > { %1523 = vrot.lane.b32.xlu1 %v4009_v4, %s4146_s7  ;;  %v1400_v17 = vshrl.u32 %v820_v5, 16  ;;  %v1401_v56 = vshrl.u32 %v854_v11, 16  ;;  %v1370_v47 = vshrl.u32 %v4795_v33, 16  ;;  %v1371_v12 = vshrl.u32 %v4799_v22, 16  ;;  %s4160_s7 = smov 72  }
  0xfe   : > { %v1105_v54 = vcombine.high %v4715_v3, %v4702_v52  ;;  %v1072_v32 = vcombine.high %v4718_v16, %v4705_v2  ;;  %v4003_v28 = vcombine.low %v1345_v27, %v1387_v38  ;;  %v1414_v33 = vpack.i.b16 %v1413_v8, %v1412_v18 }
  0xff   : > { %1593 = vrot.lane.b32.xlu0 %v4024_v24, %s4143_s30  ;;  %v1348_v52 = vpack.i.b16 %v1347_v30, %v1346_v35  ;;  %v1390_v3 = vpack.i.b16 %v1389_v44, %v1388_v34  ;;  %v1358_v2 = vshrl.u32 %v4813_v15, 16  ;;  %v1359_v16 = vshrl.u32 %v786_v60, 16 }
 0x100   : > { %v1186_v22 = vrot.slane %v1171_v58, %v4440_v43  ;;  %v4015_v51 = vcombine.low %v1357_v49, %v1399_v6  ;;  %v1372_v37 = vpack.i.b16 %v1371_v12, %v1370_v47  ;;  %v1120_v20 = vrot.slane %v1105_v54, %v4440_v43 }
 0x101   : > { %1607 = vrot.lane.b32.xlu1 %v4027_v61, %s4153_s14  ;;  %v1087_v4 = vrot.slane %v1072_v32, %v4440_v43  ;;  %v1236_v62 = vcombine.low %v4838_v42, %v4841_v13  ;;  %v1402_v21 = vpack.i.b16 %v1401_v56, %v1400_v17  ;;  %v1203_v10 = vcombine.low %v4845_v55, %v4848_v46 }
 0x102   : > { %v4030_v0 = vcombine.low %v1372_v37, %v1414_v33  ;;  %v1436_v63 = vshrl.u32 %v5969_v57, 16  ;;  %v1437_v15 = vshrl.u32 %v5970_v40, 16  ;;  %v1360_v60 = vpack.i.b16 %v1359_v16, %v1358_v2 }
 0x103   : > { %1481 = vrot.lane.b32.xlu0 %v4000_v41, %s4149_s10  ;;  %v4006_v24 = vcombine.low %v1348_v52, %v1390_v3  ;;  %v1417_v50 = vpack.i.b16 %v1186_v22, %v1153_v23  ;;  %v1244_v25 = vrot.slane %v1236_v62, %v4440_v43  ;;  %v1375_v1 = vpack.i.b16 %v1120_v20, %v1087_v4  ;;  %v1752_v62 = vld [vmem:[%s5941_s2] sm:$0xff]  ;;  %s4163_s10 = smov 86  }
 0x104   : > { %v4018_v9 = vcombine.low %v1360_v60, %v1402_v21  ;;  %v1211_v5 = vrot.slane %v1203_v10, %v4440_v43  ;;  %v1438_v11 = vpack.i.b16 %v1437_v15, %v1436_v63  ;;  %v1418_v61 = vshrl.u32 %v1153_v23, 16 }
 0x105   : > { %1537 = vrot.lane.b32.xlu1 %v4012_v19, %s4151_s12  ;;  %v1419_v14 = vshrl.u32 %v1186_v22, 16  ;;  %v1376_v27 = vshrl.u32 %v1087_v4, 16  ;;  %v1377_v35 = vshrl.u32 %v1120_v20, 16  ;;  %v4033_v38 = vcombine.low %v1375_v1, %v1417_v50 }
 0x106   : > { %v1405_v49 = vpack.i.b16 %v4744_v29, %v4747_v45  ;;  %v888_v30 = vcombine.high %v5969_v57, %v5967_v36  ;;  %v922_v34 = vcombine.high %v5970_v40, %v5967_v36  ;;  %v1363_v41 = vpack.i.b16 %v4758_v53, %v4761_v59 }
 0x107   : > { %1495 = vrot.lane.b32.xlu0 %v4003_v28, %s4150_s11  ;;  %v4013_v7 = vcombine.low %v1438_v11, %v1438_v11  ;;  %v1420_v18 = vpack.i.b16 %v1419_v14, %v1418_v61  ;;  %v1448_v8 = vshrl.u32 %v1211_v5, 16  ;;  %v1449_v44 = vshrl.u32 %v1244_v25, 16  ;;  %s4164_s11 = smov 16  }
 0x108   : > { %v1378_v19 = vpack.i.b16 %v1377_v35, %v1376_v27  ;;  %v4021_v6 = vcombine.low %v1363_v41, %v1405_v49  ;;  %v1441_v29 = vpack.i.b16 %v922_v34, %v888_v30  ;;  %v1212_v45 = vcombine.high %v1211_v5, %v5967_v36 }
 0x109   : > { %1551 = vrot.lane.b32.xlu1 %v4015_v51, %s4155_s16  ;;  %v1245_v39 = vcombine.high %v1244_v25, %v5967_v36  ;;  %v1237_v17 = vcombine.high %v4838_v42, %v4841_v13  ;;  %v1204_v53 = vcombine.high %v4845_v55, %v4848_v46  ;;  %v1450_v56 = vpack.i.b16 %v1449_v44, %v1448_v8 }
 0x10a   : > { %v4036_v59 = vcombine.low %v1378_v19, %v1420_v18  ;;  %v1442_v58 = vshrl.u32 %v888_v30, 16  ;;  %v1443_v48 = vshrl.u32 %v922_v34, 16  ;;  %v4016_v47 = vcombine.low %v1441_v29, %v1441_v29 }
 0x10b   : > { %1621 = vrot.lane.b32.xlu0 %v4030_v0, %s4154_s15  ;;  %v1453_v12 = vpack.i.b16 %v1245_v39, %v1212_v45  ;;  %v1454_v54 = vshrl.u32 %v1212_v45, 16  ;;  %v1455_v32 = vshrl.u32 %v1245_v39, 16  ;;  %v1252_v28 = vrot.slane %v1237_v17, %v4440_v43 }
 0x10c   : > { %v1219_v33 = vrot.slane %v1204_v53, %v4440_v43  ;;  %v4025_v42 = vcombine.low %v1450_v56, %v1450_v56  ;;  %v1444_v13 = vpack.i.b16 %v1443_v48, %v1442_v58  ;;  %v1447_v3 = vpack.i.b16 %v1244_v25, %v1211_v5  ;;  %v5971_v25 = vld [vmem:[#allocation2_spill] sm:$0xff] }
 0x10d   : > { %1509 = vrot.lane.b32.xlu1 %v4006_v24, %s4152_s13  ;;  %v4028_v55 = vcombine.low %v1453_v12, %v1453_v12  ;;  %v1456_v46 = vpack.i.b16 %v1455_v32, %v1454_v54  ;;  %v1461_v16 = vshrl.u32 %v1252_v28, 16  ;;  %s4166_s13 = smov 30  }
 0x10e   : > { %v4019_v52 = vcombine.low %v1444_v13, %v1444_v13  ;;  %v1460_v2 = vshrl.u32 %v1219_v33, 16  ;;  %v1459_v23 = vpack.i.b16 %v1252_v28, %v1219_v33  ;;  %v4022_v51 = vcombine.low %v1447_v3, %v1447_v3 }
 0x10f   : > { %1565 = vrot.lane.b32.xlu0 %v4018_v9, %s4156_s17  ;;  %v4031_v22 = vcombine.low %v1456_v46, %v1456_v46 }
 0x110   : > { %v1462_v37 = vpack.i.b16 %v1461_v16, %v1460_v2  ;;  %v4034_v20 = vcombine.low %v1459_v23, %v1459_v23 }
 0x111   : > { %1635 = vrot.lane.b32.xlu1 %v4033_v38, %s4148_s9  ;;  %v1522_v10 = vpop.permute.xlu1 %1521 }
 0x112   : > { %v4037_v4 = vcombine.low %v1462_v37, %v1462_v37 }
 0x113   : > { %1539 = vrot.lane.b32.xlu0 %v4013_v7, %s4151_s12  ;;  %s4165_s12 = smov 58  }
 0x115   : > { %1579 = vrot.lane.b32.xlu1 %v4021_v6, %s4147_s8 }
 0x117   : > { %1649 = vrot.lane.b32.xlu0 %v4036_v59, %s4157_s18 }
 0x119   : > { %1553 = vrot.lane.b32.xlu1 %v4016_v47, %s4155_s16  ;;  %v5972_v47 = vld [vmem:[#allocation3_spill] sm:$0xff] }
 0x11b   : > { %1595 = vrot.lane.b32.xlu0 %v4025_v42, %s4143_s30 }
 0x11d   : > { %1609 = vrot.lane.b32.xlu1 %v4028_v55, %s4153_s14 }
 0x11f   : > { %1567 = vrot.lane.b32.xlu0 %v4019_v52, %s4156_s17  ;;  %s4168_s17 = smov 88  }
 0x121   : > { %1623 = vrot.lane.b32.xlu1 %v4031_v22, %s4154_s15  ;;  %v1578_v21 = vpop.permute.xlu0 %1577  ;;  %v1634_v57 = vpop.permute.xlu1 %1633  ;;  %s4167_s15 = smov 74  }
 0x123   : > { %1581 = vrot.lane.b32.xlu0 %v4022_v51, %s4147_s8  ;;  %s4161_s8 = smov 114  }
 0x125   : > { %1637 = vrot.lane.b32.xlu1 %v4034_v20, %s4148_s9  ;;  %v1480_v0 = vpop.permute.xlu0 %1479  ;;  %s4162_s9 = smov 44  }
 0x126   : > { %v1656_v9 = vsel %vm1653_vm6, %v5971_v25, %v1480_v0 }
 0x127   : > { %1651 = vrot.lane.b32.xlu0 %v4037_v4, %s4157_s18  ;;  %v3998_v4 = vcombine.low %v4741_v26, %v4741_v26  ;;  %s4169_s18 = smov 102  }
 0x129   : > { %1755 = vperm.xlu1 %4114, %v1752_v62   ;;  %v1592_v63 = vpop.permute.xlu0 %1591 }
 0x157   : > { %v4899_v40 = vpop.permute.xlu1 %1525 }
 0x159   : > { %v4901_v15 = vpop.permute.xlu0 %1483 }
 0x15b   : > { %v1494_v60 = vpop.permute.xlu1 %1493 }
 0x15c   : > { %v1665_v1 = vsel %vm1663_vm7, %v1656_v9, %v1494_v60 }
 0x15d   : > { %v4903_v24 = vpop.permute.xlu0 %1497 }
 0x15f   : > { %v1536_v50 = vpop.permute.xlu1 %1535 }
 0x161   : > { %v1508_v5 = vpop.permute.xlu0 %1507 }
 0x162   : > { %v1672_v11 = vsel %vm1670_vm8, %v1665_v1, %v1508_v5 }
 0x163   : > { %v1606_v61 = vpop.permute.xlu1 %1605  ;;  %v1679_v14 = vsel %vm1677_vm9, %v1672_v11, %v1522_v10  ;;  %v1662_v10 = vsel %vm1653_vm6, %v3998_v4, %v4901_v15 }
 0x164   : > { %v1723_v27 = vsel %vm1721_vm10, %v1592_v63, %v1606_v61  ;;  %v1686_v38 = vsel %vm1684_vm11, %v1679_v14, %v1536_v50 }
 0x165   : > { %v1620_v35 = vpop.permute.xlu0 %1619 }
 0x166   : > { %v1730_v30 = vsel %vm1728_vm12, %v1723_v27, %v1620_v35 }
 0x167   : > { %v1550_v49 = vpop.permute.xlu1 %1549  ;;  %v1737_v8 = vsel %vm1735_vm15, %v1730_v30, %v1634_v57  ;;  %v1669_v57 = vsel %vm1663_vm7, %v1662_v10, %v4903_v24  ;;  %v1751_v30 = vld [vmem:[%s5940_s1] sm:$0xf] }
 0x168   : > { %v1693_v34 = vsel %vm1691_vm13, %v1686_v38, %v1550_v49 }
 0x169   : > { %v1564_v41 = vpop.permute.xlu0 %1563 }
 0x16a   : > { %v1700_v7 = vsel %vm1698_vm14, %v1693_v34, %v1564_v41 }
 0x16b   : > { %v1648_v18 = vpop.permute.xlu1 %1647  ;;  %v1707_v44 = vsel %vm1705_vm0, %v1700_v7, %v1578_v21 }
 0x16c   : > { %v1744_v19 = vsel %vm1742_vm1, %v1737_v8, %v1648_v18  ;;  %v1714_v6 = vsel %vm1712_vm2, %v1707_v44, %v1592_v63 }
 0x16d   : > { %v1512_v29 = vpop.permute.xlu0 %1511  ;;  %1767 = vmatprep.subr.bf16.mxu0 %v1744_v19 }
 0x16e   : > { %1768 = vmatpush1.bf16.msra.mxu0 %v1714_v6  ;;  %v1676_v63 = vsel %vm1670_vm8, %v1669_v57, %v1512_v29 }
 0x16f   : > { %v1524_v45 = vpop.permute.xlu1 %1523  ;;  %v1683_v25 = vsel %vm1677_vm9, %v1676_v63, %v4899_v40 }
 0x171   : > { %v1594_v39 = vpop.permute.xlu0 %1593 }
 0x173   : > { %v1608_v17 = vpop.permute.xlu1 %1607 }
 0x174   : > { %v1725_v3 = vsel %vm1721_vm10, %v1594_v39, %v1608_v17 }
 0x175   : > { %v1482_v53 = vpop.permute.xlu0 %1481 }
 0x176   : > { %v1659_v12 = vsel %vm1653_vm6, %v5972_v47, %v1482_v53  ;;  %vm3616_vm6 = vcmask 195584  }
 0x177   : > { %v1538_v59 = vpop.permute.xlu1 %1537 }
 0x179   : > { %v1496_v56 = vpop.permute.xlu0 %1495 }
 0x17a   : > { %v1667_v54 = vsel %vm1663_vm7, %v1659_v12, %v1496_v56  ;;  %vm3637_vm7 = vcmask 392192  }
 0x17b   : > { %v1552_v58 = vpop.permute.xlu1 %1551 }
 0x17d   : > { %v1622_v48 = vpop.permute.xlu0 %1621 }
 0x17e   : > { %v1732_v22 = vsel %vm1728_vm12, %v1725_v3, %v1622_v48 }
 0x17f   : > { %v1510_v32 = vpop.permute.xlu1 %1509 }
 0x180   : > { %v1674_v28 = vsel %vm1670_vm8, %v1667_v54, %v1510_v32  ;;  %vm3648_vm8 = vcmask 490496  }
 0x181   : > { %v1681_v33 = vsel %vm1677_vm9, %v1674_v28, %v1524_v45  ;;  %v1566_v42 = vpop.permute.xlu0 %1565  ;;  %vm3659_vm9 = vcmask 588800  }
 0x182   : > { %v1688_v13 = vsel %vm1684_vm11, %v1681_v33, %v1538_v59 }
 0x183   : > { %v1636_v55 = vpop.permute.xlu1 %1635  ;;  %v1695_v46 = vsel %vm1691_vm13, %v1688_v13, %v1552_v58 }
 0x184   : > { %v1702_v2 = vsel %vm1698_vm14, %v1695_v46, %v1566_v42  ;;  %v1739_v51 = vsel %vm1735_vm15, %v1732_v22, %v1636_v55 }
 0x185   : > { %v1540_v52 = vpop.permute.xlu0 %1539 }
 0x186   : > { %v1690_v26 = vsel %vm1684_vm11, %v1683_v25, %v1540_v52  ;;  %vm3680_vm11 = vcmask 785408  }
 0x187   : > { %v1580_v16 = vpop.permute.xlu1 %1579 }
 0x188   : > { %v1709_v23 = vsel %vm1705_vm0, %v1702_v2, %v1580_v16 }
 0x189   : > { %v1650_v37 = vpop.permute.xlu0 %1649  ;;  %v1717_v21 = vsel %vm1712_vm2, %v1709_v23, %v1594_v39 }
 0x18a   : > { %v1747_v20 = vsel %vm1742_vm1, %v1739_v51, %v1650_v37 }
 0x18b   : > { %1769 = vmatprep.subr.bf16.mxu0 %v1747_v20  ;;  %v1554_v62 = vpop.permute.xlu1 %1553 }
 0x18c   : > { %1770 = vmatpush1.bf16.msra.mxu0 %v1717_v21  ;;  %v1697_v1 = vsel %vm1691_vm13, %v1690_v26, %v1554_v62 }
 0x18d   : > { %v1596_v0 = vpop.permute.xlu0 %1595 }
 0x18f   : > { %v1610_v60 = vpop.permute.xlu1 %1609 }
 0x190   : > { %v1727_v15 = vsel %vm1721_vm10, %v1596_v0, %v1610_v60 }
 0x191   : > { %v1568_v50 = vpop.permute.xlu0 %1567 }
 0x192   : > { %v1704_v5 = vsel %vm1698_vm14, %v1697_v1, %v1568_v50  ;;  %vm3702_vm14 = vcmask 982016  }
 0x193   : > { %v1624_v9 = vpop.permute.xlu1 %1623 }
 0x194   : > { %v1734_v24 = vsel %vm1728_vm12, %v1727_v15, %v1624_v9  ;;  %vm3691_vm12 = vcmask 883712  }
 0x195   : > { %v1582_v11 = vpop.permute.xlu0 %1581 }
 0x196   : > { %v1711_v61 = vsel %vm1705_vm0, %v1704_v5, %v1582_v11  ;;  %vm3826_vm0 = vcmask 130048  }
 0x197   : > { %v1638_v14 = vpop.permute.xlu1 %1637  ;;  %v1720_v40 = vsel %vm1712_vm2, %v1711_v61, %v1596_v0  ;;  %vm3835_vm2 = vcmask 7168  }
 0x198   : > { %v1741_v27 = vsel %vm1735_vm15, %v1734_v24, %v1638_v14  ;;  %v1763_v49 = vsel %vm1762_vm3, %v1720_v40, 0  ;;  %vm3717_vm15 = vcmask 31744  }
 0x199   : > { %v1652_v35 = vpop.permute.xlu0 %1651 }
 0x19a   : > { %v1750_v38 = vsel %vm1742_vm1, %v1741_v27, %v1652_v35 }
 0x19b   : > { %4038 = vmatprep.subr.msk.bf16.mxu0 %vm1762_vm3, %v1750_v38 }
 0x19c   : > { %1772 = vmatpush1.bf16.msra.mxu0 %v1763_v49 }
 0x19f   : > { %4039 = vmatmul.mubr.msk.bf16.vlgmr.msra.gmra.mrb[0].mxu0 %vm1758_vm4, %v1751_v30 }
 0x1a8   : > { %v1756_v34 = vpop.permute.xlu1 %1755 }
 0x272   : > { %v1801_v41 = vpop.f32.mrb[0].mxu0 }
 0x273   : > { %v1802_v7 = vadd.f32 %v1801_v41, %v1756_v34  ;;  %v1803_v18 = vpop.f32.mrb[1].mxu0 }
 0x274   : > { %v1805_v8 = vpop.f32.mrb[2].mxu0  ;;  %v1804_v45 = vadd.f32 %v1803_v18, %v1756_v34 }
 0x275   : > { %v1808_v44 = vmul.f32 0.1, %v1802_v7  ;;  %v1806_v19 = vpop.f32.mrb[3].mxu0 }
 0x276   : > { %v1809_v39 = vmul.f32 0.1, %v1804_v45 }
 0x277   : > { %v1810_v6 = vmax.f32 %v1802_v7, %v1808_v44 }
 0x278   : > { %v1811_v17 = vmax.f32 %v1804_v45, %v1809_v39 }
 0x279   : > { %v1812_v29 = vpack.c.bf16 %v1810_v6, %v1810_v6 }
 0x27a   : > { %v1813_v53 = vpack.c.bf16 %v1811_v17, %v1811_v17 }
 0x27b   : > { %1818 = vrot.lane.b32.xlu1 %v1812_v29, %s4158_s27  ;;  %1840 = vrot.lane.b32.xlu0 %v1812_v29, %s4159_s28  ;;  %s4176_s27 = smov 108  }
 0x27f   : > { %1824 = vrot.lane.b32.xlu1 %v1812_v29, %s4160_s7  ;;  %1815 = vrot.lane.b32.xlu0 %v1812_v29, %s4161_s8  ;;  %s4178_s8 = smov 36  }
 0x283   : > { %1830 = vrot.lane.b32.xlu1 %v1812_v29, %s4162_s9  ;;  %1821 = vrot.lane.b32.xlu0 %v1812_v29, %s4163_s10 }
 0x287   : > { %1836 = vrot.lane.b32.xlu1 %v1812_v29, %s4164_s11  ;;  %1827 = vrot.lane.b32.xlu0 %v1812_v29, %s4165_s12  ;;  %s4048_s12 = sshll.u32 %s5999_s21, 4 }
 0x28b   : > { %1842 = vrot.lane.b32.xlu1 %v1813_v53, %s4159_s28  ;;  %1833 = vrot.lane.b32.xlu0 %v1812_v29, %s4166_s13  ;;  %s4177_s28 = smov 4  }
 0x28f   : > { %1854 = vrot.lane.b32.xlu1 %v1813_v53, %s4167_s15  ;;  %1851 = vrot.lane.b32.xlu0 %v1813_v53, %s4168_s17  ;;  %s301_s17 = scalar_lea.vmem %s5944_s5, %s4048_s12 }
 0x293   : > { %1849 = vrot.lane.b32.xlu1 %v1813_v53, %s4169_s18  ;;  %1847 = vrot.lane.b32.xlu0 %v1813_v53, %s4170_s19  ;;  %s311_s19 = scalar_lea.vmem %s5945_s6, %s4048_s12 }
 0x2ed   : > { %v1819_v59 = vpop.permute.xlu1 %1818  ;;  %v1841_v56 = vpop.permute.xlu0 %1840 }
 0x2f1   : > { %v1825_v58 = vpop.permute.xlu1 %1824  ;;  %v1816_v48 = vpop.permute.xlu0 %1815 }
 0x2f2   : > { %v1857_v46 = vcombine.low %v1812_v29, %v1825_v58 }
 0x2f4   : > { %v1864_v20 = vrot.slane %v1857_v46, %v4434_v31 }
 0x2f5   : > { %v1831_v47 = vpop.permute.xlu1 %1830  ;;  %v1822_v12 = vpop.permute.xlu0 %1821 }
 0x2f6   : > { %v1865_v13 = vcombine.low %v1819_v59, %v1831_v47 }
 0x2f8   : > { %v1872_v51 = vrot.slane %v1865_v13, %v4434_v31 }
 0x2f9   : > { %v1837_v54 = vpop.permute.xlu1 %1836  ;;  %v1828_v32 = vpop.permute.xlu0 %1827 }
 0x2fa   : > { %v1925_v55 = vcombine.low %v1816_v48, %v1828_v32  ;;  %v1889_v50 = vcombine.low %v1864_v20, %v1872_v51  ;;  %v1890_v25 = vcombine.high %v1864_v20, %v1872_v51 }
 0x2fc   : > { %v1932_v37 = vrot.slane %v1925_v55, %v4434_v31  ;;  %v1897_v40 = vrot.slane %v1889_v50, %v4440_v43  ;;  %v1904_v35 = vrot.slane %v1890_v25, %v4440_v43 }
 0x2fd   : > { %v1843_v28 = vpop.permute.xlu1 %1842  ;;  %v1834_v33 = vpop.permute.xlu0 %1833 }
 0x2fe   : > { %v1933_v42 = vcombine.low %v1822_v12, %v1834_v33  ;;  %v1845_v52 = vsel %vm1844_vm5, %v1841_v56, %v1843_v28 }
 0x300   : > { %v1940_v3 = vrot.slane %v1933_v42, %v4434_v31 }
 0x301   : > { %v1855_v2 = vpop.permute.xlu1 %1854  ;;  %v1852_v16 = vpop.permute.xlu0 %1851 }
 0x302   : > { %v1941_v22 = vcombine.low %v1845_v52, %v1855_v2  ;;  %v1873_v23 = vcombine.low %v1837_v54, %v1852_v16  ;;  %v1957_v4 = vcombine.low %v1932_v37, %v1940_v3  ;;  %v1958_v62 = vcombine.high %v1932_v37, %v1940_v3 }
 0x304   : > { %v1948_v0 = vrot.slane %v1941_v22, %v4434_v31  ;;  %v1880_v57 = vrot.slane %v1873_v23, %v4434_v31  ;;  %v1965_v11 = vrot.slane %v1957_v4, %v4440_v43  ;;  %v1972_v15 = vrot.slane %v1958_v62, %v4440_v43 }
 0x305   : > { %v1850_v21 = vpop.permute.xlu1 %1849  ;;  %v1848_v10 = vpop.permute.xlu0 %1847 }
 0x306   : > { %v1956_v63 = vrot.slane %v1850_v21, %v4434_v31  ;;  %v1888_v60 = vrot.slane %v1848_v10, %v4434_v31 }
 0x308   : > { %v1973_v26 = vcombine.low %v1948_v0, %v1956_v63  ;;  %v1974_v9 = vcombine.high %v1948_v0, %v1956_v63  ;;  %v1905_v1 = vcombine.low %v1880_v57, %v1888_v60  ;;  %v1906_v5 = vcombine.high %v1880_v57, %v1888_v60 }
 0x30a   : > { %v1981_v61 = vrot.slane %v1973_v26, %v4440_v43  ;;  %v1988_v24 = vrot.slane %v1974_v9, %v4440_v43  ;;  %v1913_v14 = vrot.slane %v1905_v1, %v4440_v43  ;;  %v1920_v27 = vrot.slane %v1906_v5, %v4440_v43 }
 0x30c   : > { %v1989_v38 = vcombine.low %v1965_v11, %v1981_v61  ;;  %v1990_v49 = vcombine.high %v1965_v11, %v1981_v61  ;;  %v1991_v30 = vcombine.low %v1972_v15, %v1988_v24  ;;  %v1992_v34 = vcombine.high %v1972_v15, %v1988_v24 }
 0x30d   : > { %v1921_v41 = vcombine.low %v1897_v40, %v1913_v14  ;;  %v1922_v7 = vcombine.high %v1897_v40, %v1913_v14  ;;  %v1923_v18 = vcombine.low %v1904_v35, %v1920_v27  ;;  %v1924_v8 = vcombine.high %v1904_v35, %v1920_v27 }
 0x30e   : > { %v1998_v44 = vshrl.u32 %v1989_v38, 16  ;;  %v2006_v19 = vshrl.u32 %v1990_v49, 16  ;;  %v2014_v6 = vshrl.u32 %v1991_v30, 16  ;;  %v2022_v29 = vshrl.u32 %v1992_v34, 16 }
 0x30f   : > { %v4972_v45 = vpack.i.b16 %v1989_v38, %v1921_v41  ;;  %v1997_v39 = vshrl.u32 %v1921_v41, 16  ;;  %v4974_v17 = vpack.i.b16 %v1990_v49, %v1922_v7  ;;  %v2005_v53 = vshrl.u32 %v1922_v7, 16 }
 0x310   : > { %v4976_v59 = vpack.i.b16 %v1991_v30, %v1923_v18  ;;  %v2013_v56 = vshrl.u32 %v1923_v18, 16  ;;  %v4978_v58 = vpack.i.b16 %v1992_v34, %v1924_v8  ;;  %v2021_v48 = vshrl.u32 %v1924_v8, 16 }
 0x311   : > { %v4980_v47 = vpack.i.b16 %v1998_v44, %v1997_v39  ;;  %v4982_v12 = vpack.i.b16 %v2006_v19, %v2005_v53  ;;  %2025 = vrot.lane.b32.xlu0 %v4972_v45, %s4142_s29  ;;  %v4987_v54 = vrot.slane %v4972_v45, 1  ;;  %v4990_v32 = vrot.slane %v4974_v17, 1 }
 0x312   : > { %v4992_v28 = vpack.i.b16 %v2014_v6, %v2013_v56  ;;  %v4994_v33 = vpack.i.b16 %v2022_v29, %v2021_v48  ;;  %v4997_v42 = vrot.slane %v4976_v59, 1  ;;  %v5000_v13 = vrot.slane %v4978_v58, 1 }
 0x313   : > { %2027 = vrot.lane.b32.xlu1 %v4980_v47, %s4142_s29  ;;  %v5005_v55 = vrot.slane %v4980_v47, 1  ;;  %v5008_v46 = vrot.slane %v4982_v12, 1  ;;  %v2249_v62 = vcombine.low %v4972_v45, %v4976_v59  ;;  %v2265_v21 = vcombine.low %v4974_v17, %v4978_v58 }
 0x314   : > { %v2957_v52 = vcombine.low %v4987_v54, %v4997_v42  ;;  %v2958_v3 = vcombine.high %v4987_v54, %v4997_v42  ;;  %v5015_v2 = vrot.slane %v4992_v28, 1  ;;  %v2973_v16 = vcombine.low %v4990_v32, %v5000_v13 }
 0x315   : > { %2029 = vrot.lane.b32.xlu0 %v4974_v17, %s4142_s29  ;;  %v2974_v22 = vcombine.high %v4990_v32, %v5000_v13  ;;  %v5024_v23 = vrot.slane %v4994_v33, 1  ;;  %v2367_v10 = vcombine.low %v4980_v47, %v4992_v28  ;;  %v5049_v0 = vrot.slane %v2249_v62, %v4434_v31 }
 0x316   : > { %v3075_v51 = vcombine.low %v5005_v55, %v5015_v2  ;;  %v3076_v37 = vcombine.high %v5005_v55, %v5015_v2  ;;  %v2383_v57 = vcombine.low %v4982_v12, %v4994_v33  ;;  %v5056_v63 = vrot.slane %v2265_v21, %v4434_v31 }
 0x317   : > { %2031 = vrot.lane.b32.xlu1 %v4982_v12, %s4142_s29  ;;  %v3091_v20 = vcombine.low %v5008_v46, %v5024_v23  ;;  %v3092_v4 = vcombine.high %v5008_v46, %v5024_v23  ;;  %v5061_v60 = vrot.slane %v2367_v10, %v4434_v31  ;;  %v2250_v5 = vcombine.high %v4972_v45, %v4976_v59 }
 0x318   : > { %v5064_v50 = vrot.slane %v2383_v57, %v4434_v31  ;;  %v2313_v25 = vcombine.low %v5049_v0, %v5056_v63  ;;  %v2314_v9 = vcombine.high %v5049_v0, %v5056_v63  ;;  %v2266_v11 = vcombine.high %v4974_v17, %v4978_v58 }
 0x319   : > { %2033 = vrot.lane.b32.xlu0 %v4976_v59, %s4142_s29  ;;  %v5083_v15 = vrot.slane %v2250_v5, %v4434_v31  ;;  %v2368_v24 = vcombine.high %v4980_v47, %v4992_v28  ;;  %v2384_v14 = vcombine.high %v4982_v12, %v4994_v33  ;;  %v5095_v27 = vrot.slane %v2973_v16, %v4434_v31 }
 0x31a   : > { %v2431_v26 = vcombine.low %v5061_v60, %v5064_v50  ;;  %v2432_v1 = vcombine.high %v5061_v60, %v5064_v50  ;;  %v5086_v61 = vrot.slane %v2266_v11, %v4434_v31  ;;  %v5098_v40 = vrot.slane %v2974_v22, %v4434_v31 }
 0x31b   : > { %2035 = vrot.lane.b32.xlu1 %v4992_v28, %s4142_s29  ;;  %v5101_v35 = vrot.slane %v2957_v52, %v4434_v31  ;;  %v5106_v49 = vrot.slane %v2368_v24, %v4434_v31  ;;  %v5109_v30 = vrot.slane %v2958_v3, %v4434_v31  ;;  %v5114_v34 = vrot.slane %v2384_v14, %v4434_v31 }
 0x31c   : > { %v2329_v38 = vcombine.low %v5083_v15, %v5086_v61  ;;  %v5119_v7 = vrot.slane %v3091_v20, %v4434_v31  ;;  %v5122_v18 = vrot.slane %v3092_v4, %v4434_v31  ;;  %v5127_v44 = vrot.slane %v3075_v51, %v4434_v31 }
 0x31d   : > { %2037 = vrot.lane.b32.xlu0 %v4978_v58, %s4142_s29  ;;  %v3021_v41 = vcombine.low %v5101_v35, %v5095_v27  ;;  %v3037_v8 = vcombine.low %v5109_v30, %v5098_v40  ;;  %v5130_v19 = vrot.slane %v3076_v37, %v4434_v31  ;;  %v2447_v6 = vcombine.low %v5106_v49, %v5114_v34 }
 0x31e   : > { %v2076_v48 = vshll.u32 %v4972_v45, 16  ;;  %v2083_v52 = vshll.u32 %v4980_v47, 16  ;;  %v2090_v3 = vshll.u32 %v4974_v17, 16  ;;  %v2081_v16 = vshrl.u32 %v4980_v47, 16 }
 0x31f   : > { %2039 = vrot.lane.b32.xlu1 %v4994_v33, %s4142_s29  ;;  %v2111_v37 = vshll.u32 %v4992_v28, 16  ;;  %v2118_v4 = vshll.u32 %v4978_v58, 16  ;;  %v2125_v10 = vshll.u32 %v4994_v33, 16  ;;  %v2109_v5 = vshrl.u32 %v4992_v28, 16 }
 0x320   : > { %v2092_v22 = vrot.slane %v2090_v3, 1  ;;  %v2116_v24 = vshrl.u32 %v4978_v58, 16  ;;  %v5290_v60 = vrot.slane %v3021_v41, %v4440_v43 }
 0x321   : > { %2049 = vrot.lane.b32.xlu0 %v4972_v45, %s4143_s30  ;;  %v2113_v21 = vrot.slane %v2111_v37, 1  ;;  %v2127_v14 = vrot.slane %v2125_v10, 1 }
 0x323   : > { %2051 = vrot.lane.b32.xlu1 %v4980_v47, %s4143_s30  ;;  %v2095_v47 = vshrl.u32 %v4982_v12, 16  ;;  %v5211_v11 = vor.u32 %v2113_v21, %v2109_v5 }
 0x325   : > { %2053 = vrot.lane.b32.xlu0 %v4974_v17, %s4143_s30 }
 0x327   : > { %2055 = vrot.lane.b32.xlu1 %v4982_v12, %s4143_s30 }
 0x329   : > { %2057 = vrot.lane.b32.xlu0 %v4976_v59, %s4143_s30 }
 0x32b   : > { %2059 = vrot.lane.b32.xlu1 %v4992_v28, %s4143_s30 }
 0x32d   : > { %2061 = vrot.lane.b32.xlu0 %v4978_v58, %s4143_s30 }
 0x32f   : > { %2063 = vrot.lane.b32.xlu1 %v4994_v33, %s4143_s30 }
 0x331   : > { %2201 = vrot.lane.b32.xlu0 %v4987_v54, %s4142_s29 }
 0x333   : > { %2203 = vrot.lane.b32.xlu1 %v5005_v55, %s4142_s29 }
 0x335   : > { %2205 = vrot.lane.b32.xlu0 %v4990_v32, %s4142_s29 }
 0x337   : > { %2207 = vrot.lane.b32.xlu1 %v5008_v46, %s4142_s29 }
 0x339   : > { %2209 = vrot.lane.b32.xlu0 %v4997_v42, %s4142_s29 }
 0x33b   : > { %2211 = vrot.lane.b32.xlu1 %v5015_v2, %s4142_s29 }
 0x33d   : > { %2213 = vrot.lane.b32.xlu0 %v5000_v13, %s4142_s29 }
 0x33f   : > { %2215 = vrot.lane.b32.xlu1 %v5024_v23, %s4142_s29 }
 0x341   : > { %2225 = vrot.lane.b32.xlu0 %v4987_v54, %s4143_s30  ;;  %v2078_v54 = vrot.slane %v2076_v48, 1  ;;  %v2123_v48 = vshrl.u32 %v4994_v33, 16 }
 0x343   : > { %2227 = vrot.lane.b32.xlu1 %v5005_v55, %s4143_s30  ;;  %v2085_v55 = vrot.slane %v2083_v52, 1  ;;  %v2128_v52 = vor.u32 %v2127_v14, %v2123_v48 }
 0x345   : > { %2229 = vrot.lane.b32.xlu0 %v4990_v32, %s4143_s30  ;;  %v2074_v32 = vshrl.u32 %v4972_v45, 16  ;;  %v5191_v51 = vor.u32 %v2085_v55, %v2081_v16  ;;  %v2088_v45 = vshrl.u32 %v4974_v17, 16  ;;  %v2102_v17 = vshrl.u32 %v4976_v59, 16 }
 0x347   : > { %2231 = vrot.lane.b32.xlu1 %v5008_v46, %s4143_s30  ;;  %v2097_v46 = vshll.u32 %v4982_v12, 16  ;;  %v2120_v12 = vrot.slane %v2118_v4, 1  ;;  %v2635_v28 = vcombine.low %v5191_v51, %v5211_v11  ;;  %v2636_v4 = vcombine.high %v5191_v51, %v5211_v11 }
 0x349   : > { %2233 = vrot.lane.b32.xlu0 %v4997_v42, %s4143_s30  ;;  %v5185_v42 = vor.u32 %v2078_v54, %v2074_v32 }
 0x34b   : > { %2235 = vrot.lane.b32.xlu1 %v5015_v2, %s4143_s30  ;;  %v2104_v2 = vshll.u32 %v4976_v59, 16  ;;  %v2121_v59 = vor.u32 %v2120_v12, %v2116_v24  ;;  %v2321_v24 = vrot.slane %v2313_v25, %v4440_v43 }
 0x34d   : > { %2237 = vrot.lane.b32.xlu0 %v5000_v13, %s4143_s30  ;;  %v2099_v13 = vrot.slane %v2097_v46, 1  ;;  %v2106_v20 = vrot.slane %v2104_v2, 1  ;;  %v5247_v2 = vrot.slane %v2635_v28, %v4434_v31 }
 0x34f   : > { %2239 = vrot.lane.b32.xlu1 %v5024_v23, %s4143_s30  ;;  %v5197_v23 = vor.u32 %v2092_v22, %v2088_v45  ;;  %v5203_v62 = vor.u32 %v2099_v13, %v2095_v47  ;;  %v2107_v57 = vor.u32 %v2106_v20, %v2102_v17 }
 0x351   : > { %2137 = vrot.lane.b32.xlu0 %v5185_v42, %s4142_s29  ;;  %v2517_v58 = vcombine.low %v5185_v42, %v2107_v57  ;;  %v2533_v33 = vcombine.low %v5197_v23, %v2121_v59  ;;  %v2651_v54 = vcombine.low %v5203_v62, %v2128_v52  ;;  %v2518_v20 = vcombine.high %v5185_v42, %v2107_v57 }
 0x352   : > { %v2534_v17 = vcombine.high %v5197_v23, %v2121_v59  ;;  %v2652_v21 = vcombine.high %v5203_v62, %v2128_v52 }
 0x353   : > { %2139 = vrot.lane.b32.xlu1 %v5191_v51, %s4142_s29  ;;  %v5238_v46 = vrot.slane %v2533_v33, %v4434_v31  ;;  %v5241_v16 = vrot.slane %v2517_v58, %v4434_v31  ;;  %v5244_v22 = vrot.slane %v2651_v54, %v4434_v31  ;;  %v5297_v15 = vrot.slane %v2518_v20, %v4434_v31 }
 0x354   : > { %v5303_v28 = vrot.slane %v2534_v17, %v4434_v31  ;;  %v5306_v33 = vrot.slane %v2636_v4, %v4434_v31  ;;  %v5309_v54 = vrot.slane %v2652_v21, %v4434_v31  ;;  %v2454_v20 = vrot.slane %v2447_v6, %v4440_v43 }
 0x355   : > { %2141 = vrot.lane.b32.xlu0 %v5197_v23, %s4142_s29  ;;  %v2573_v37 = vcombine.low %v5241_v16, %v5238_v46  ;;  %v2691_v47 = vcombine.low %v5247_v2, %v5244_v22  ;;  %v2574_v50 = vcombine.high %v5241_v16, %v5238_v46  ;;  %v2692_v4 = vcombine.high %v5247_v2, %v5244_v22 }
 0x356   : > { %v2707_v49 = vcombine.low %v5306_v33, %v5309_v54  ;;  %v5973_v22 = vcombine.low %v5127_v44, %v5119_v7 }
 0x357   : > { %2143 = vrot.lane.b32.xlu1 %v5203_v62, %s4142_s29  ;;  %v5277_v25 = vrot.slane %v2573_v37, %v4440_v43  ;;  %v2706_v40 = vrot.slane %v2692_v4, %v4440_v43  ;;  %v5975_v4 = vcombine.high %v5101_v35, %v5095_v27 }
 0x358   : > { %v2714_v30 = vrot.slane %v2707_v49, %v4440_v43  ;;  %v5432_v2 = vrot.slane %v5973_v22, %v4440_v43 }
 0x359   : > { %2145 = vrot.lane.b32.xlu0 %v2107_v57, %s4142_s29 }
 0x35b   : > { %2147 = vrot.lane.b32.xlu1 %v5211_v11, %s4142_s29 }
 0x35d   : > { %2149 = vrot.lane.b32.xlu0 %v2121_v59, %s4142_s29 }
 0x35f   : > { %2151 = vrot.lane.b32.xlu1 %v2128_v52, %s4142_s29  ;;  %s4171_s29 = smov 24  }
 0x361   : > { %2161 = vrot.lane.b32.xlu0 %v5185_v42, %s4143_s30  ;;  %v5266_v42 = vrot.slane %v2431_v26, %v4440_v43  ;;  %v2336_v26 = vrot.slane %v2329_v38, %v4440_v43 }
 0x363   : > { %2163 = vrot.lane.b32.xlu1 %v5191_v51, %s4143_s30  ;;  %v2328_v51 = vrot.slane %v2314_v9, %v4440_v43 }
 0x365   : > { %2165 = vrot.lane.b32.xlu0 %v5197_v23, %s4143_s30  ;;  %v2446_v23 = vrot.slane %v2432_v1, %v4440_v43 }
 0x367   : > { %2167 = vrot.lane.b32.xlu1 %v5203_v62, %s4143_s30 }
 0x369   : > { %2169 = vrot.lane.b32.xlu0 %v2107_v57, %s4143_s30 }
 0x36b   : > { %2171 = vrot.lane.b32.xlu1 %v5211_v11, %s4143_s30  ;;  %v5280_v11 = vrot.slane %v2691_v47, %v4440_v43 }
 0x36d   : > { %2173 = vrot.lane.b32.xlu0 %v2121_v59, %s4143_s30 }
 0x36f   : > { %2175 = vrot.lane.b32.xlu1 %v2128_v52, %s4143_s30  ;;  %s4172_s30 = smov 48  }
 0x383   : > { %v2026_v3 = vpop.permute.xlu0 %2025 }
 0x385   : > { %v2028_v32 = vpop.permute.xlu1 %2027 }
 0x387   : > { %v2030_v55 = vpop.permute.xlu0 %2029 }
 0x389   : > { %v2032_v45 = vpop.permute.xlu1 %2031 }
 0x38b   : > { %v2034_v13 = vpop.permute.xlu0 %2033 }
 0x38c   : > { %v2281_v10 = vcombine.low %v2026_v3, %v2034_v13  ;;  %v2282_v5 = vcombine.high %v2026_v3, %v2034_v13 }
 0x38d   : > { %v2036_v12 = vpop.permute.xlu1 %2035 }
 0x38e   : > { %v2399_v62 = vcombine.low %v2028_v32, %v2036_v12  ;;  %v2289_v9 = vrot.slane %v2281_v10, %v4434_v31  ;;  %v2296_v1 = vrot.slane %v2282_v5, %v4434_v31  ;;  %v2400_v14 = vcombine.high %v2028_v32, %v2036_v12 }
 0x38f   : > { %v2038_v57 = vpop.permute.xlu0 %2037 }
 0x390   : > { %v2297_v0 = vcombine.low %v2030_v55, %v2038_v57  ;;  %v2298_v63 = vcombine.high %v2030_v55, %v2038_v57  ;;  %v2407_v41 = vrot.slane %v2399_v62, %v4434_v31  ;;  %v2414_v37 = vrot.slane %v2400_v14, %v4434_v31 }
 0x391   : > { %v2040_v59 = vpop.permute.xlu1 %2039 }
 0x392   : > { %v2305_v61 = vrot.slane %v2297_v0, %v4434_v31  ;;  %v2312_v38 = vrot.slane %v2298_v63, %v4434_v31  ;;  %v2415_v48 = vcombine.low %v2032_v45, %v2040_v59  ;;  %v2416_v52 = vcombine.high %v2032_v45, %v2040_v59 }
 0x393   : > { %v2050_v58 = vpop.permute.xlu0 %2049  ;;  %v2589_v0 = vcombine.low %v5297_v15, %v5303_v28  ;;  %v5974_v28 = vcombine.low %v5130_v19, %v5122_v18  ;;  %v5976_v18 = vcombine.high %v5127_v44, %v5119_v7 }
 0x394   : > { %v2337_v3 = vcombine.low %v2289_v9, %v2305_v61  ;;  %v2338_v32 = vcombine.high %v2289_v9, %v2305_v61  ;;  %v2353_v55 = vcombine.low %v2296_v1, %v2312_v38  ;;  %v2423_v13 = vrot.slane %v2415_v48, %v4434_v31 }
 0x395   : > { %v2430_v45 = vrot.slane %v2416_v52, %v4434_v31  ;;  %v2052_v47 = vpop.permute.xlu1 %2051  ;;  %v5438_v33 = vrot.slane %v5974_v28, %v4440_v43  ;;  %v5456_v19 = vrot.slane %v5976_v18, %v4440_v43 }
 0x396   : > { %v2345_v17 = vrot.slane %v2337_v3, %v4440_v43  ;;  %v2352_v21 = vrot.slane %v2338_v32, %v4440_v43  ;;  %v2360_v10 = vrot.slane %v2353_v55, %v4440_v43  ;;  %v2455_v5 = vcombine.low %v2407_v41, %v2423_v13 }
 0x397   : > { %v2456_v12 = vcombine.high %v2407_v41, %v2423_v13  ;;  %v2471_v62 = vcombine.low %v2414_v37, %v2430_v45  ;;  %v2054_v57 = vpop.permute.xlu0 %2053 }
 0x398   : > { %v2463_v34 = vrot.slane %v2455_v5, %v4440_v43  ;;  %v5328_v6 = vcombine.high %v2321_v24, %v2345_v17  ;;  %v2363_v63 = vcombine.low %v2328_v51, %v2352_v21  ;;  %v5330_v9 = vcombine.high %v2328_v51, %v2352_v21 }
 0x399   : > { %v2470_v1 = vrot.slane %v2456_v12, %v4440_v43  ;;  %v2478_v14 = vrot.slane %v2471_v62, %v4440_v43  ;;  %v2056_v59 = vpop.permute.xlu1 %2055  ;;  %v5334_v61 = vcombine.low %v2336_v26, %v2360_v10  ;;  %v5336_v38 = vcombine.high %v2336_v26, %v2360_v10 }
 0x39a   : > { %v2480_v48 = vcombine.high %v5266_v42, %v2463_v34  ;;  %v3326_v52 = vshrl.u32 %v2363_v63, 16  ;;  %v3332_v41 = vshrl.u32 %v5330_v9, 16  ;;  %v5340_v3 = vcombine.low %v2321_v24, %v2345_v17 }
 0x39b   : > { %v2058_v32 = vpop.permute.xlu0 %2057  ;;  %v2481_v55 = vcombine.low %v2446_v23, %v2470_v1  ;;  %v2482_v51 = vcombine.high %v2446_v23, %v2470_v1  ;;  %v5342_v13 = vcombine.low %v2454_v20, %v2478_v14  ;;  %v5344_v37 = vcombine.high %v2454_v20, %v2478_v14 }
 0x39c   : > { %v2485_v45 = vcombine.low %v2050_v58, %v2058_v32  ;;  %v2486_v21 = vcombine.high %v2050_v58, %v2058_v32  ;;  %v3319_v5 = vpack.i.b16 %v2480_v48, %v5328_v6  ;;  %v5348_v26 = vcombine.low %v5266_v42, %v2463_v34 }
 0x39d   : > { %v2060_v10 = vpop.permute.xlu1 %2059  ;;  %v3325_v12 = vpack.i.b16 %v2481_v55, %v2363_v63  ;;  %v3331_v62 = vpack.i.b16 %v2482_v51, %v5330_v9  ;;  %v3337_v24 = vpack.i.b16 %v5342_v13, %v5334_v61  ;;  %v3327_v34 = vshrl.u32 %v2481_v55, 16 }
 0x39e   : > { %v2493_v20 = vrot.slane %v2485_v45, %v4434_v31  ;;  %v2500_v17 = vrot.slane %v2486_v21, %v4434_v31  ;;  %v2603_v58 = vcombine.low %v2052_v47, %v2060_v10  ;;  %v2604_v1 = vcombine.high %v2052_v47, %v2060_v10  ;;  %3501 = vrot.lane.b32.xlu1 %v3319_v5, %s4171_s29 }
 0x39f   : > { %v2062_v42 = vpop.permute.xlu0 %2061  ;;  %v3333_v63 = vshrl.u32 %v2482_v51, 16  ;;  %v3314_v9 = vshrl.u32 %v5340_v3, 16  ;;  %v3315_v14 = vshrl.u32 %v5348_v26, 16  ;;  %v5362_v21 = vpack.i.b16 %v3327_v34, %v3326_v52 }
 0x3a0   : > { %v2611_v32 = vrot.slane %v2603_v58, %v4434_v31  ;;  %v2618_v23 = vrot.slane %v2604_v1, %v4434_v31  ;;  %v2501_v56 = vcombine.low %v2054_v57, %v2062_v42  ;;  %v2502_v45 = vcombine.high %v2054_v57, %v2062_v42 }
 0x3a1   : > { %v2064_v53 = vpop.permute.xlu1 %2063  ;;  %v5364_v47 = vpack.i.b16 %v3333_v63, %v3332_v41  ;;  %v5366_v10 = vpack.i.b16 %v3315_v14, %v3314_v9  ;;  %v3320_v55 = vshrl.u32 %v5328_v6, 16  ;;  %v3321_v57 = vshrl.u32 %v2480_v48, 16 }
 0x3a2   : > { %v2509_v51 = vrot.slane %v2501_v56, %v4434_v31  ;;  %v2516_v5 = vrot.slane %v2502_v45, %v4434_v31  ;;  %v2619_v39 = vcombine.low %v2056_v59, %v2064_v53  ;;  %v2620_v29 = vcombine.high %v2056_v59, %v2064_v53  ;;  %3521 = vrot.lane.b32.xlu1 %v3325_v12, %s4172_s30 }
 0x3a3   : > { %v5372_v58 = vpop.permute.xlu0 %2201  ;;  %v3338_v52 = vshrl.u32 %v5334_v61, 16  ;;  %v3339_v41 = vshrl.u32 %v5342_v13, 16  ;;  %v3344_v1 = vshrl.u32 %v5336_v38, 16  ;;  %v5381_v59 = vpack.i.b16 %v3321_v57, %v3320_v55 }
 0x3a4   : > { %v2549_v42 = vcombine.low %v2493_v20, %v2509_v51  ;;  %v2550_v6 = vcombine.high %v2493_v20, %v2509_v51  ;;  %v2565_v34 = vcombine.low %v2500_v17, %v2516_v5  ;;  %v2627_v56 = vrot.slane %v2619_v39, %v4434_v31 }
 0x3a5   : > { %v2634_v63 = vrot.slane %v2620_v29, %v4434_v31  ;;  %v5379_v53 = vpop.permute.xlu1 %2203  ;;  %v5383_v12 = vpack.i.b16 %v3339_v41, %v3338_v52  ;;  %v3345_v48 = vshrl.u32 %v5344_v37, 16  ;;  %v5399_v51 = vrot.slane %v3037_v8, %v4440_v43 }
 0x3a6   : > { %v2557_v61 = vrot.slane %v2549_v42, %v4440_v43  ;;  %v2564_v13 = vrot.slane %v2550_v6, %v4440_v43  ;;  %v2572_v9 = vrot.slane %v2565_v34, %v4440_v43  ;;  %v2667_v20 = vcombine.low %v2611_v32, %v2627_v56  ;;  %3541 = vrot.lane.b32.xlu1 %v3331_v62, %s4160_s7 }
 0x3a7   : > { %v2668_v39 = vcombine.high %v2611_v32, %v2627_v56  ;;  %v2683_v17 = vcombine.low %v2618_v23, %v2634_v63  ;;  %v2206_v29 = vpop.permute.xlu0 %2205  ;;  %v5390_v14 = vpack.i.b16 %v3345_v48, %v3344_v1  ;;  %v2588_v62 = vrot.slane %v2574_v50, %v4440_v43 }
 0x3a8   : > { %v2675_v55 = vrot.slane %v2667_v20, %v4440_v43  ;;  %v2596_v23 = vrot.slane %v2589_v0, %v4440_v43  ;;  %v5421_v8 = vcombine.high %v2557_v61, %v5277_v25  ;;  %v5444_v0 = vrot.slane %v5975_v4, %v4440_v43 }
 0x3a9   : > { %v2682_v32 = vrot.slane %v2668_v39, %v4440_v43  ;;  %v2690_v5 = vrot.slane %v2683_v17, %v4440_v43  ;;  %v2208_v57 = vpop.permute.xlu1 %2207  ;;  %v2599_v16 = vcombine.low %v2564_v13, %v2588_v62  ;;  %v5459_v41 = vcombine.low %v2557_v61, %v5277_v25 }
 0x3aa   : > { %3561 = vrot.lane.b32.xlu1 %v3337_v24, %s4173_s20  ;;  %v5424_v46 = vcombine.high %v2675_v55, %v5280_v11  ;;  %v5426_v50 = vcombine.low %v2572_v9, %v2596_v23  ;;  %v5463_v42 = vcombine.high %v2564_v13, %v2588_v62  ;;  %v5466_v6 = vcombine.low %v2675_v55, %v5280_v11 }
 0x3ab   : > { %v2210_v15 = vpop.permute.xlu0 %2209  ;;  %v2717_v54 = vcombine.low %v2682_v32, %v2706_v40  ;;  %v5448_v24 = vcombine.high %v2682_v32, %v2706_v40  ;;  %v5450_v52 = vcombine.low %v2690_v5, %v2714_v30  ;;  %5977 = vst [vmem:[#allocation5_spill] sm:$0xff] %v5459_v41  ;;  %v5979_v7 = vpack.i.b16 %v5344_v37, %v5336_v38 }
 0x3ac   : > { %v3355_v49 = vpack.i.b16 %v5424_v46, %v5421_v8  ;;  %v2989_v27 = vcombine.low %v5372_v58, %v2210_v15  ;;  %v2990_v35 = vcombine.high %v5372_v58, %v2210_v15  ;;  %5978 = vst [vmem:[#allocation4_spill] sm:$0xff] %v5466_v6  ;;  %v3362_v44 = vshrl.u32 %v2599_v16, 16 }
 0x3ad   : > { %v2212_v1 = vpop.permute.xlu1 %2211  ;;  %v3374_v25 = vshrl.u32 %v5426_v50, 16  ;;  %v5473_v34 = vcombine.high %v2572_v9, %v2596_v23  ;;  %v3361_v63 = vpack.i.b16 %v2717_v54, %v2599_v16  ;;  %v3363_v48 = vshrl.u32 %v2717_v54, 16 }
 0x3ae   : > { %3581 = vrot.lane.b32.xlu1 %v5979_v7, %s4174_s25  ;;  %v3107_v56 = vcombine.low %v5379_v53, %v2212_v1  ;;  %3503 = vrot.lane.b32.xlu0 %v3355_v49, %s4171_s29  ;;  %v5477_v11 = vcombine.high %v2690_v5, %v2714_v30  ;;  %v3367_v38 = vpack.i.b16 %v5448_v24, %v5463_v42  ;;  %v3375_v55 = vshrl.u32 %v5450_v52, 16 }
 0x3af   : > { %v2214_v58 = vpop.permute.xlu0 %2213  ;;  %v3373_v37 = vpack.i.b16 %v5450_v52, %v5426_v50  ;;  %v2997_v9 = vrot.slane %v2989_v27, %v4434_v31  ;;  %v3004_v20 = vrot.slane %v2990_v35, %v4434_v31  ;;  %v3108_v39 = vcombine.high %v5379_v53, %v2212_v1 }
 0x3b0   : > { %v3005_v61 = vcombine.low %v2206_v29, %v2214_v58  ;;  %v3006_v13 = vcombine.high %v2206_v29, %v2214_v58  ;;  %v3115_v5 = vrot.slane %v3107_v56, %v4434_v31  ;;  %v3364_v30 = vpack.i.b16 %v3363_v48, %v3362_v44 }
 0x3b1   : > { %v2216_v17 = vpop.permute.xlu1 %2215  ;;  %v3379_v53 = vpack.i.b16 %v5477_v11, %v5473_v34  ;;  %v3381_v16 = vshrl.u32 %v5477_v11, 16  ;;  %v3122_v28 = vrot.slane %v3108_v39, %v4434_v31  ;;  %v3376_v4 = vpack.i.b16 %v3375_v55, %v3374_v25 }
 0x3b2   : > { %v3013_v62 = vrot.slane %v3005_v61, %v4434_v31  ;;  %v3020_v23 = vrot.slane %v3006_v13, %v4434_v31  ;;  %v3123_v29 = vcombine.low %v2208_v57, %v2216_v17  ;;  %v3124_v32 = vcombine.high %v2208_v57, %v2216_v17  ;;  %3531 = vrot.lane.b32.xlu1 %v5362_v21, %s4175_s26 }
 0x3b3   : > { %3523 = vrot.lane.b32.xlu0 %v3361_v63, %s4172_s30  ;;  %v2226_v40 = vpop.permute.xlu0 %2225  ;;  %v3380_v49 = vshrl.u32 %v5473_v34, 16  ;;  %v3350_v45 = vshrl.u32 %v5459_v41, 16 }
 0x3b4   : > { %v3045_v50 = vcombine.low %v2997_v9, %v3013_v62  ;;  %v3046_v15 = vcombine.high %v2997_v9, %v3013_v62  ;;  %v3061_v22 = vcombine.low %v3004_v20, %v3020_v23  ;;  %v3131_v57 = vrot.slane %v3123_v29, %v4434_v31 }
 0x3b5   : > { %v3138_v21 = vrot.slane %v3124_v32, %v4434_v31  ;;  %v2228_v54 = vpop.permute.xlu1 %2227  ;;  %v3382_v56 = vpack.i.b16 %v3381_v16, %v3380_v49 }
 0x3b6   : > { %v3053_v52 = vrot.slane %v3045_v50, %v4440_v43  ;;  %v3060_v18 = vrot.slane %v3046_v15, %v4440_v43  ;;  %v3068_v27 = vrot.slane %v3061_v22, %v4440_v43  ;;  %v3163_v35 = vcombine.low %v3115_v5, %v3131_v57  ;;  %3551 = vrot.lane.b32.xlu1 %v5364_v47, %s4155_s16 }
 0x3b7   : > { %v3164_v1 = vcombine.high %v3115_v5, %v3131_v57  ;;  %v3179_v7 = vcombine.low %v3122_v28, %v3138_v21  ;;  %3543 = vrot.lane.b32.xlu0 %v3367_v38, %s4160_s7  ;;  %v2230_v44 = vpop.permute.xlu0 %2229 }
 0x3b8   : > { %v5509_v34 = vcombine.low %v5290_v60, %v3053_v52  ;;  %v5512_v58 = vcombine.high %v5399_v51, %v3068_v27  ;;  %v3171_v63 = vrot.slane %v3163_v35, %v4440_v43  ;;  %v5516_v48 = vcombine.low %v5444_v0, %v3060_v18 }
 0x3b9   : > { %v3178_v47 = vrot.slane %v3164_v1, %v4440_v43  ;;  %v3186_v11 = vrot.slane %v3179_v7, %v4440_v43  ;;  %v2232_v61 = vpop.permute.xlu1 %2231  ;;  %v5521_v13 = vcombine.high %v5444_v0, %v3060_v18  ;;  %v5524_v38 = vcombine.low %v5399_v51, %v3068_v27 }
 0x3ba   : > { %5980 = vst [vmem:[#allocation2_spill] sm:$0xff] %v5509_v34  ;;  %v5527_v9 = vcombine.low %v5432_v2, %v3171_v63  ;;  %3533 = vrot.lane.b32.xlu1 %v3364_v30, %s4175_s26  ;;  %v3422_v20 = vshrl.u32 %v5509_v34, 16  ;;  %v3452_v39 = vshrl.u32 %v5512_v58, 16  ;;  %v5533_v17 = vcombine.high %v5290_v60, %v3053_v52 }
 0x3bb   : > { %v5536_v55 = vcombine.high %v5438_v33, %v3186_v11  ;;  %3563 = vrot.lane.b32.xlu0 %v3373_v37, %s4173_s20  ;;  %v2234_v0 = vpop.permute.xlu0 %2233  ;;  %v3189_v51 = vcombine.low %v5456_v19, %v3178_v47  ;;  %v5541_v62 = vcombine.high %v5456_v19, %v3178_v47  ;;  %v5544_v23 = vcombine.low %v5438_v33, %v3186_v11 }
 0x3bc   : > { %5981 = vst [vmem:[#allocation3_spill] sm:$0xff] %v5527_v9  ;;  %v3193_v29 = vcombine.low %v2226_v40, %v2234_v0  ;;  %v3194_v32 = vcombine.high %v2226_v40, %v2234_v0  ;;  %v3423_v5 = vshrl.u32 %v5527_v9, 16  ;;  %v3440_v60 = vshrl.u32 %v5521_v13, 16 }
 0x3bd   : > { %v2236_v30 = vpop.permute.xlu1 %2235  ;;  %v3433_v16 = vpack.i.b16 %v3189_v51, %v5516_v48  ;;  %v3439_v37 = vpack.i.b16 %v5541_v62, %v5521_v13  ;;  %v3445_v50 = vpack.i.b16 %v5544_v23, %v5524_v38  ;;  %v3441_v19 = vshrl.u32 %v5541_v62, 16 }
 0x3be   : > { %v3201_v33 = vrot.slane %v3193_v29, %v4434_v31  ;;  %v3208_v15 = vrot.slane %v3194_v32, %v4434_v31  ;;  %v3252_v40 = vcombine.low %v2228_v54, %v2236_v30  ;;  %v3253_v22 = vcombine.high %v2228_v54, %v2236_v30  ;;  %3573 = vrot.lane.b32.xlu1 %v3376_v4, %s4176_s27 }
 0x3bf   : > { %3583 = vrot.lane.b32.xlu0 %v3379_v53, %s4174_s25  ;;  %v2238_v57 = vpop.permute.xlu0 %2237  ;;  %v5558_v28 = vpack.i.b16 %v3423_v5, %v3422_v20  ;;  %v5560_v21 = vpack.i.b16 %v3441_v19, %v3440_v60  ;;  %v3446_v49 = vshrl.u32 %v5524_v38, 16  ;;  %v3447_v52 = vshrl.u32 %v5544_v23, 16 }
 0x3c0   : > { %v3260_v18 = vrot.slane %v3252_v40, %v4434_v31  ;;  %v3267_v27 = vrot.slane %v3253_v22, %v4434_v31  ;;  %v3209_v35 = vcombine.low %v2230_v44, %v2238_v57  ;;  %v3210_v54 = vcombine.high %v2230_v44, %v2238_v57 }
 0x3c1   : > { %v2240_v1 = vpop.permute.xlu1 %2239  ;;  %v5566_v7 = vpack.i.b16 %v3447_v52, %v3446_v49  ;;  %v3453_v53 = vshrl.u32 %v5536_v55, 16  ;;  %v5570_v4 = vcombine.high %v5432_v2, %v3171_v63  ;;  %v3428_v63 = vshrl.u32 %v5533_v17, 16 }
 0x3c2   : > { %v3217_v11 = vrot.slane %v3209_v35, %v4434_v31  ;;  %v3224_v20 = vrot.slane %v3210_v54, %v4434_v31  ;;  %v3268_v0 = vcombine.low %v2232_v61, %v2240_v1  ;;  %v3269_v29 = vcombine.high %v2232_v61, %v2240_v1  ;;  %3593 = vrot.lane.b32.xlu1 %v3382_v56, %s4177_s28 }
 0x3c3   : > { %v5577_v44 = vpop.permute.xlu0 %2137  ;;  %v5579_v32 = vpack.i.b16 %v3453_v53, %v3452_v39  ;;  %v3429_v5 = vshrl.u32 %v5570_v4, 16  ;;  %v3434_v39 = vshrl.u32 %v5516_v48, 16  ;;  %v3435_v57 = vshrl.u32 %v3189_v51, 16 }
 0x3c4   : > { %v3225_v60 = vcombine.low %v3201_v33, %v3217_v11  ;;  %v3226_v30 = vcombine.high %v3201_v33, %v3217_v11  ;;  %v3241_v19 = vcombine.low %v3208_v15, %v3224_v20  ;;  %v3276_v40 = vrot.slane %v3268_v0, %v4434_v31 }
 0x3c5   : > { %v3283_v61 = vrot.slane %v3269_v29, %v4434_v31  ;;  %v5587_v22 = vpop.permute.xlu1 %2139  ;;  %v5589_v56 = vpack.i.b16 %v3429_v5, %v3428_v63  ;;  %v5598_v54 = vpack.i.b16 %v3435_v57, %v3434_v39  ;;  %v3369_v47 = vshrl.u32 %v5448_v24, 16 }
 0x3c6   : > { %v5593_v49 = vrot.slane %v3225_v60, %v4440_v43  ;;  %v3284_v52 = vcombine.low %v3260_v18, %v3276_v40  ;;  %3527 = vrot.lane.b32.xlu1 %v3433_v16, %s4172_s30  ;;  %v3285_v35 = vcombine.high %v3260_v18, %v3276_v40  ;;  %v5604_v53 = vrot.slane %v3226_v30, %v4440_v43 }
 0x3c7   : > { %v3300_v33 = vcombine.low %v3267_v27, %v3283_v61  ;;  %v5596_v15 = vpop.permute.xlu0 %2141  ;;  %v5607_v48 = vrot.slane %v3241_v19, %v4440_v43 }
 0x3c8   : > { %v5601_v1 = vrot.slane %v3284_v52, %v4440_v43  ;;  %v5610_v51 = vrot.slane %v3285_v35, %v4440_v43  ;;  %v5619_v27 = vcombine.high %v5593_v49, %v5967_v36 }
 0x3c9   : > { %v5613_v16 = vrot.slane %v3300_v33, %v4440_v43  ;;  %v5615_v18 = vpop.permute.xlu1 %2143  ;;  %v5638_v60 = vcombine.high %v5607_v48, %v5967_v36  ;;  %v3482_v39 = vshrl.u32 %v5607_v48, 16 }
 0x3ca   : > { %v5623_v11 = vcombine.high %v5601_v1, %v5967_v36  ;;  %v3469_v0 = vpack.i.b16 %v5610_v51, %v5604_v53 }
 0x3cb   : > { %v5625_v20 = vpop.permute.xlu0 %2145  ;;  %v5642_v30 = vcombine.high %v5613_v16, %v5967_v36  ;;  %v3483_v57 = vshrl.u32 %v5613_v16, 16  ;;  %v3488_v52 = vshrl.u32 %v5638_v60, 16 }
 0x3cc   : > { %v3463_v63 = vpack.i.b16 %v5623_v11, %v5619_v27  ;;  %3529 = vrot.lane.b32.xlu0 %v3469_v0, %s4172_s30  ;;  %v3351_v0 = vshrl.u32 %v5466_v6, 16 }
 0x3cd   : > { %v5634_v5 = vpop.permute.xlu1 %2147  ;;  %v3489_v35 = vshrl.u32 %v5642_v30, 16 }
 0x3ce   : > { %3509 = vrot.lane.b32.xlu1 %v3463_v63, %s4171_s29 }
 0x3cf   : > { %v5645_v19 = vpop.permute.xlu0 %2149  ;;  %v5666_v63 = vpack.i.b16 %v3489_v35, %v3488_v52  ;;  %v3356_v52 = vshrl.u32 %v5421_v8, 16  ;;  %v2839_v8 = vcombine.low %v5587_v22, %v5634_v5 }
 0x3d0   : > { %3491 = vrot.lane.b32.xlu0 %v5366_v10, %s4153_s14  ;;  %v5664_v10 = vpack.i.b16 %v3483_v57, %v3482_v39  ;;  %v3357_v39 = vshrl.u32 %v5424_v46, 16  ;;  %v2737_v38 = vcombine.low %v5596_v15, %v5645_v19  ;;  %v2721_v46 = vcombine.low %v5577_v44, %v5625_v20 }
 0x3d1   : > { %v5651_v61 = vpop.permute.xlu1 %2151  ;;  %v2847_v40 = vrot.slane %v2839_v8, %v4434_v31  ;;  %v3368_v8 = vshrl.u32 %v5463_v42, 16 }
 0x3d2   : > { %3547 = vrot.lane.b32.xlu1 %v3439_v37, %s4160_s7  ;;  %v3352_v37 = vpack.i.b16 %v3351_v0, %v3350_v45  ;;  %v2855_v45 = vcombine.low %v5615_v18, %v5651_v61  ;;  %v2745_v0 = vrot.slane %v2737_v38, %v4434_v31 }
 0x3d3   : > { %v5661_v33 = vpop.permute.xlu0 %2161  ;;  %v3370_v6 = vpack.i.b16 %v3369_v47, %v3368_v8 }
 0x3d4   : > { %3511 = vrot.lane.b32.xlu0 %v5381_v59, %s4178_s8 }
 0x3d5   : > { %v5670_v25 = vpop.permute.xlu1 %2163 }
 0x3d6   : > { %3567 = vrot.lane.b32.xlu1 %v3445_v50, %s4173_s20  ;;  %v3358_v50 = vpack.i.b16 %v3357_v39, %v3356_v52  ;;  %v2863_v39 = vrot.slane %v2855_v45, %v4434_v31 }
 0x3d7   : > { %v5679_v62 = vpop.permute.xlu0 %2165 }
 0x3d8   : > { %3493 = vrot.lane.b32.xlu0 %v3352_v37, %s4153_s14  ;;  %v2903_v2 = vcombine.low %v2847_v40, %v2863_v39  ;;  %v2904_v9 = vcombine.high %v2847_v40, %v2863_v39 }
 0x3d9   : > { %v2168_v57 = vpop.permute.xlu1 %2167 }
 0x3da   : > { %3497 = vrot.lane.b32.xlu1 %v5558_v28, %s4153_s14  ;;  %v2918_v42 = vrot.slane %v2904_v9, %v4440_v43 }
 0x3db   : > { %v5690_v23 = vpop.permute.xlu0 %2169 }
 0x3dc   : > { %3513 = vrot.lane.b32.xlu0 %v3358_v50, %s4178_s8  ;;  %v2753_v28 = vcombine.low %v5661_v33, %v5690_v23  ;;  %v2729_v50 = vrot.slane %v2721_v46, %v4434_v31 }
 0x3dd   : > { %v2172_v35 = vpop.permute.xlu1 %2171 }
 0x3de   : > { %3557 = vrot.lane.b32.xlu1 %v5560_v21, %s4155_s16  ;;  %v2871_v52 = vcombine.low %v5670_v25, %v2172_v35  ;;  %v2761_v29 = vrot.slane %v2753_v28, %v4434_v31  ;;  %v2785_v45 = vcombine.low %v2729_v50, %v2745_v0  ;;  %v2786_v24 = vcombine.high %v2729_v50, %v2745_v0 }
 0x3df   : > { %v2174_v37 = vpop.permute.xlu0 %2173 }
 0x3e0   : > { %v2769_v13 = vcombine.low %v5679_v62, %v2174_v37  ;;  %3571 = vrot.lane.b32.xlu0 %v5383_v12, %s4176_s27  ;;  %v2879_v46 = vrot.slane %v2871_v52, %v4434_v31  ;;  %v2793_v52 = vrot.slane %v2785_v45, %v4440_v43  ;;  %v2770_v47 = vcombine.high %v5679_v62, %v2174_v37 }
 0x3e1   : > { %v2176_v59 = vpop.permute.xlu1 %2175  ;;  %v2800_v9 = vrot.slane %v2786_v24, %v4440_v43 }
 0x3e2   : > { %v2777_v21 = vrot.slane %v2769_v13, %v4434_v31  ;;  %v2887_v38 = vcombine.low %v2168_v57, %v2176_v59  ;;  %3577 = vrot.lane.b32.xlu1 %v5566_v7, %s4176_s27  ;;  %v2888_v40 = vcombine.high %v2168_v57, %v2176_v59  ;;  %v2722_v57 = vcombine.high %v5577_v44, %v5625_v20 }
 0x3e4   : > { %v2809_v34 = vcombine.low %v2761_v29, %v2777_v21  ;;  %v2895_v12 = vrot.slane %v2887_v38, %v4434_v31  ;;  %3591 = vrot.lane.b32.xlu0 %v5390_v14, %s4177_s28  ;;  %v2810_v13 = vcombine.high %v2761_v29, %v2777_v21  ;;  %v2911_v38 = vrot.slane %v2903_v2, %v4440_v43 }
 0x3e5   : > { %v2856_v14 = vcombine.high %v5615_v18, %v5651_v61  ;;  %v2738_v18 = vcombine.high %v5596_v15, %v5645_v19  ;;  %v2754_v61 = vcombine.high %v5661_v33, %v5690_v23  ;;  %v3458_v15 = vshrl.u32 %v5593_v49, 16 }
 0x3e6   : > { %v2817_v28 = vrot.slane %v2809_v34, %v4440_v43  ;;  %v2927_v41 = vcombine.low %v2879_v46, %v2895_v12  ;;  %3597 = vrot.lane.b32.xlu1 %v5579_v32, %s4177_s28  ;;  %v2928_v7 = vcombine.high %v2879_v46, %v2895_v12  ;;  %v2872_v34 = vcombine.high %v5670_v25, %v2172_v35 }
 0x3e7   : > { %v2824_v32 = vrot.slane %v2810_v13, %v4440_v43  ;;  %v3459_v25 = vshrl.u32 %v5601_v1, 16  ;;  %v2870_v19 = vrot.slane %v2856_v14, %v4434_v31  ;;  %v2784_v23 = vrot.slane %v2770_v47, %v4434_v31 }
 0x3e8   : > { %v2935_v39 = vrot.slane %v2927_v41, %v4440_v43  ;;  %v2942_v29 = vrot.slane %v2928_v7, %v4440_v43  ;;  %3553 = vrot.lane.b32.xlu0 %v3370_v6, %s4155_s16  ;;  %v2834_v0 = vcombine.high %v2793_v52, %v2817_v28  ;;  %v2840_v41 = vcombine.high %v5587_v22, %v5634_v5 }
 0x3e9   : > { %v2902_v6 = vrot.slane %v2888_v40, %v4434_v31  ;;  %v5982_v22 = vpack.i.b16 %v5570_v4, %v5533_v17  ;;  %v3471_v5 = vshrl.u32 %v5610_v51, 16  ;;  %v2886_v33 = vrot.slane %v2872_v34, %v4434_v31 }
 0x3ea   : > { %v2952_v2 = vcombine.high %v2911_v38, %v2935_v39  ;;  %v5744_v59 = vcombine.low %v2918_v42, %v2942_v29  ;;  %v5748_v35 = vcombine.low %v2911_v38, %v2935_v39  ;;  %v5760_v44 = vcombine.low %v2800_v9, %v2824_v32 }
 0x3eb   : > { %v2854_v20 = vrot.slane %v2840_v41, %v4434_v31  ;;  %v2752_v37 = vrot.slane %v2738_v18, %v4434_v31  ;;  %v5764_v17 = vcombine.low %v2793_v52, %v2817_v28  ;;  %v3460_v4 = vpack.i.b16 %v3459_v25, %v3458_v15 }
 0x3ec   : > { %v3391_v62 = vpack.i.b16 %v2952_v2, %v2834_v0  ;;  %3507 = vrot.lane.b32.xlu0 %v5982_v22, %s4171_s29  ;;  %v2768_v50 = vrot.slane %v2754_v61, %v4434_v31  ;;  %v2943_v21 = vcombine.low %v2886_v33, %v2902_v6  ;;  %v3397_v45 = vpack.i.b16 %v5744_v59, %v5760_v44 }
 0x3ed   : > { %v2954_v46 = vcombine.high %v2918_v42, %v2942_v29  ;;  %v3470_v12 = vshrl.u32 %v5604_v53, 16  ;;  %v3385_v8 = vpack.i.b16 %v5748_v35, %v5764_v17  ;;  %v2736_v13 = vrot.slane %v2722_v57, %v4434_v31 }
 0x3ee   : > { %3505 = vrot.lane.b32.xlu1 %v3391_v62, %s4171_s29  ;;  %v2919_v24 = vcombine.low %v2854_v20, %v2870_v19  ;;  %v2825_v28 = vcombine.low %v2768_v50, %v2784_v23  ;;  %v2836_v7 = vcombine.high %v2800_v9, %v2824_v32  ;;  %v3309_v38 = vcombine.high %v5610_v51, %v5967_v36 }
 0x3ef   : > { %v3472_v52 = vpack.i.b16 %v3471_v5, %v3470_v12  ;;  %v2801_v40 = vcombine.low %v2736_v13, %v2752_v37  ;;  %v2950_v39 = vrot.slane %v2943_v21, %v4440_v43  ;;  %v3393_v42 = vshrl.u32 %v2952_v2, 16 }
 0x3f0   : > { %3499 = vrot.lane.b32.xlu0 %v3460_v4, %s4153_s14  ;;  %v3403_v14 = vpack.i.b16 %v2954_v46, %v2836_v7  ;;  %v3250_v34 = vcombine.high %v5604_v53, %v5967_v36  ;;  %v2926_v31 = vrot.slane %v2919_v24, %v4440_v43  ;;  %v2832_v29 = vrot.slane %v2825_v28, %v4440_v43 }
 0x3f1   : > { %v3392_v47 = vshrl.u32 %v2834_v0, 16  ;;  %v2808_v51 = vrot.slane %v2801_v40, %v4440_v43  ;;  %v3405_v9 = vshrl.u32 %v2954_v46, 16  ;;  %v3404_v25 = vshrl.u32 %v2836_v7, 16 }
 0x3f2   : > { %3525 = vrot.lane.b32.xlu1 %v3397_v45, %s4172_s30  ;;  %v3475_v32 = vpack.i.b16 %v3309_v38, %v3250_v34  ;;  %v2955_v41 = vcombine.low %v2926_v31, %v2950_v39  ;;  %v2956_v36 = vcombine.high %v2926_v31, %v2950_v39  ;;  %v5983_v6 = vpack.i.b16 %v5536_v55, %v5512_v58 }
 0x3f3   : > { %v3394_v18 = vpack.i.b16 %v3393_v42, %v3392_v47  ;;  %v2837_v2 = vcombine.low %v2808_v51, %v2832_v29  ;;  %v3406_v53 = vpack.i.b16 %v3405_v9, %v3404_v25  ;;  %v2838_v0 = vcombine.high %v2808_v51, %v2832_v29 }
 0x3f4   : > { %3539 = vrot.lane.b32.xlu0 %v3472_v52, %s4175_s26  ;;  %v3411_v61 = vshrl.u32 %v2955_v41, 16  ;;  %v3417_v57 = vshrl.u32 %v2956_v36, 16  ;;  %v3465_v15 = vshrl.u32 %v5623_v11, 16  ;;  %v3464_v58 = vshrl.u32 %v5619_v27, 16  ;;  %v3734_v27 = vld [vmem:[%s5943_s4] sm:$0xff] }
 0x3f5   : > { %v3410_v43 = vshrl.u32 %v2837_v2, 16  ;;  %v3416_v22 = vshrl.u32 %v2838_v0, 16  ;;  %v3409_v19 = vpack.i.b16 %v2955_v41, %v2837_v2  ;;  %v5985_v11 = vpack.i.b16 %v5642_v30, %v5638_v60 }
 0x3f6   : > { %3545 = vrot.lane.b32.xlu1 %v3403_v14, %s4160_s7  ;;  %v3466_v55 = vpack.i.b16 %v3465_v15, %v3464_v58  ;;  %v3387_v33 = vshrl.u32 %v5748_v35, 16  ;;  %v3399_v20 = vshrl.u32 %v5744_v59, 16  ;;  %v3398_v60 = vshrl.u32 %v5760_v44, 16  ;;  %v3735_v44 = vld [vmem:[%s5943_s4 + $0x8] sm:$0xff] }
 0x3f7   : > { %v3412_v62 = vpack.i.b16 %v3411_v61, %v3410_v43  ;;  %v3418_v5 = vpack.i.b16 %v3417_v57, %v3416_v22  ;;  %v3477_v4 = vshrl.u32 %v3309_v38, 16  ;;  %v3476_v21 = vshrl.u32 %v3250_v34, 16 }
 0x3f8   : > { %3549 = vrot.lane.b32.xlu0 %v3475_v32, %s4160_s7  ;;  %v3400_v30 = vpack.i.b16 %v3399_v20, %v3398_v60 }
 0x3f9   : > { %v3478_v45 = vpack.i.b16 %v3477_v4, %v3476_v21 }
 0x3fa   : > { %3515 = vrot.lane.b32.xlu1 %v3394_v18, %s4178_s8 }
 0x3fc   : > { %3587 = vrot.lane.b32.xlu0 %v5983_v6, %s4174_s25 }
 0x3fe   : > { %3555 = vrot.lane.b32.xlu1 %v3406_v53, %s4155_s16 }
 0x400   : > { %3517 = vrot.lane.b32.xlu0 %v5589_v56, %s4178_s8  ;;  %v5984_v56 = vpack.i.b16 %v5613_v16, %v5607_v48  ;;  %v3386_v48 = vshrl.u32 %v5764_v17, 16 }
 0x402   : > { %3575 = vrot.lane.b32.xlu1 %v3412_v62, %s4176_s27  ;;  %v3388_v16 = vpack.i.b16 %v3387_v33, %v3386_v48 }
 0x404   : > { %3537 = vrot.lane.b32.xlu0 %v5598_v54, %s4175_s26  ;;  %v3415_v54 = vpack.i.b16 %v2956_v36, %v2838_v0  ;;  %v5988_v36 = vld [vmem:[#allocation5_spill] sm:$0xff] }
 0x406   : > { %3595 = vrot.lane.b32.xlu1 %v3418_v5, %s4177_s28 }
 0x408   : > { %3519 = vrot.lane.b32.xlu0 %v3466_v55, %s4178_s8 }
 0x40a   : > { %3569 = vrot.lane.b32.xlu1 %v5984_v56, %s4173_s20 }
 0x40c   : > { %3565 = vrot.lane.b32.xlu0 %v3409_v19, %s4173_s20 }
 0x40e   : > { %3589 = vrot.lane.b32.xlu1 %v5985_v11, %s4174_s25 }
 0x410   : > { %v3502_v23 = vpop.permute.xlu1 %3501  ;;  %3585 = vrot.lane.b32.xlu0 %v3415_v54, %s4174_s25 }
 0x412   : > { %3738 = vperm.xlu1 %4114, %v3734_v27  }
 0x414   : > { %v3522_v37 = vpop.permute.xlu1 %3521  ;;  %3495 = vrot.lane.b32.xlu0 %v3388_v16, %s4153_s14 }
 0x418   : > { %v3542_v50 = vpop.permute.xlu1 %3541  ;;  %3535 = vrot.lane.b32.xlu0 %v3400_v30, %s4175_s26 }
 0x41c   : > { %v3562_v46 = vpop.permute.xlu1 %3561  ;;  %3559 = vrot.lane.b32.xlu0 %v3478_v45, %s4155_s16  ;;  %v5990_v45 = vpack.i.b16 %v5601_v1, %v5593_v49 }
 0x420   : > { %v3582_v12 = vpop.permute.xlu1 %3581  ;;  %3579 = vrot.lane.b32.xlu0 %v5664_v10, %s4176_s27  ;;  %v3504_v59 = vpop.permute.xlu0 %3503 }
 0x424   : > { %v3532_v13 = vpop.permute.xlu1 %3531  ;;  %3599 = vrot.lane.b32.xlu0 %v5666_v63, %s4177_s28  ;;  %v5986_v63 = vpack.i.b16 %v5348_v26, %v5340_v3  ;;  %v5987_v26 = vld [vmem:[#allocation4_spill] sm:$0xff] }
 0x425   : > { %v3524_v28 = vpop.permute.xlu0 %3523  ;;  %v5989_v53 = vpack.i.b16 %v5987_v26, %v5988_v36 }
 0x428   : > { %v3552_v24 = vpop.permute.xlu1 %3551  ;;  %3743 = vperm.xlu0 %4115, %v3735_v44  }
 0x429   : > { %v3544_v52 = vpop.permute.xlu0 %3543 }
 0x42c   : > { %v3534_v7 = vpop.permute.xlu1 %3533 }
 0x42d   : > { %v3564_v40 = vpop.permute.xlu0 %3563 }
 0x430   : > { %v3574_v38 = vpop.permute.xlu1 %3573 }
 0x431   : > { %v3584_v14 = vpop.permute.xlu0 %3583 }
 0x434   : > { %v3594_v39 = vpop.permute.xlu1 %3593 }
 0x435   : > { %v3722_v33 = vsel %vm3717_vm15, %v3584_v14, %v3594_v39 }
 0x438   : > { %v5828_v42 = vpop.permute.xlu1 %3527 }
 0x43e   : > { %v5830_v10 = vpop.permute.xlu0 %3529 }
 0x440   : > { %v3510_v34 = vpop.permute.xlu1 %3509 }
 0x442   : > { %v3492_v31 = vpop.permute.xlu0 %3491 }
 0x443   : > { %v3603_v29 = vsel %vm1721_vm10, %v5986_v63, %v3492_v31 }
 0x444   : > { %v5836_v47 = vpop.permute.xlu1 %3547  ;;  %v3618_v32 = vsel %vm3616_vm6, %v3603_v29, %v3502_v23 }
 0x446   : > { %v3512_v51 = vpop.permute.xlu0 %3511 }
 0x447   : > { %v3628_v41 = vsel %vm1758_vm4, %v3618_v32, %v3512_v51 }
 0x448   : > { %v5840_v18 = vpop.permute.xlu1 %3567  ;;  %v3639_v9 = vsel %vm3637_vm7, %v3628_v41, %v3522_v37 }
 0x449   : > { %v3650_v25 = vsel %vm3648_vm8, %v3639_v9, %v3532_v13 }
 0x44a   : > { %v3494_v2 = vpop.permute.xlu0 %3493  ;;  %v3661_v0 = vsel %vm3659_vm9, %v3650_v25, %v3542_v50 }
 0x44b   : > { %v3606_v61 = vsel %vm1721_vm10, %v5989_v53, %v3494_v2  ;;  %v3671_v22 = vsel %vm1691_vm13, %v3661_v0, %v3552_v24 }
 0x44c   : > { %v3498_v3 = vpop.permute.xlu1 %3497  ;;  %v3620_v62 = vsel %vm3616_vm6, %v3606_v61, %v3504_v59  ;;  %v3682_v58 = vsel %vm3680_vm11, %v3671_v22, %v3562_v46 }
 0x44e   : > { %v3514_v6 = vpop.permute.xlu0 %3513 }
 0x44f   : > { %v3630_v57 = vsel %vm1758_vm4, %v3620_v62, %v3514_v6 }
 0x450   : > { %v5849_v43 = vpop.permute.xlu1 %3557  ;;  %v3641_v5 = vsel %vm3637_vm7, %v3630_v57, %v3524_v28 }
 0x451   : > { %v3652_v54 = vsel %vm3648_vm8, %v3641_v5, %v3534_v7 }
 0x452   : > { %v3572_v15 = vpop.permute.xlu0 %3571  ;;  %v3663_v48 = vsel %vm3659_vm9, %v3652_v54, %v3544_v52  ;;  %v5991_v52 = vld [vmem:[#allocation3_spill] sm:$0xff] }
 0x453   : > { %v3693_v55 = vsel %vm3691_vm12, %v3682_v58, %v3572_v15 }
 0x454   : > { %v5857_v56 = vpop.permute.xlu1 %3577  ;;  %v3704_v27 = vsel %vm3702_vm14, %v3693_v55, %v3582_v12 }
 0x456   : > { %v3592_v19 = vpop.permute.xlu0 %3591 }
 0x457   : > { %v3719_v11 = vsel %vm3717_vm15, %v3582_v12, %v3592_v19 }
 0x458   : > { %3759 = vmatprep.subr.bf16.mxu1 %v3719_v11  ;;  %v3598_v16 = vpop.permute.xlu1 %3597 }
 0x459   : > { %3760 = vmatpush1.bf16.msra.mxu1 %v3704_v27 }
 0x45a   : > { %3761 = vmatprep.subr.bf16.mxu1 %v3722_v33  ;;  %v3554_v23 = vpop.permute.xlu0 %3553 }
 0x45b   : > { %v3673_v20 = vsel %vm1691_vm13, %v3663_v48, %v3554_v23 }
 0x45c   : > { %v3684_v37 = vsel %vm3680_vm11, %v3673_v20, %v3564_v40 }
 0x45d   : > { %v3695_v60 = vsel %vm3691_vm12, %v3684_v37, %v3574_v38  ;;  %v5992_v38 = vld [vmem:[#allocation2_spill] sm:$0xff] }
 0x45e   : > { %v3508_v30 = vpop.permute.xlu0 %3507  ;;  %v3707_v4 = vsel %vm3702_vm14, %v3695_v60, %v3584_v14  ;;  %v5993_v40 = vpack.i.b16 %v5991_v52, %v5992_v38 }
 0x45f   : > { %3762 = vmatpush1.bf16.msra.mxu1 %v3707_v4 }
 0x460   : > { %v3506_v50 = vpop.permute.xlu1 %3505  ;;  %v3612_v39 = vsel %vm1721_vm10, %v5993_v40, %v3498_v3 }
 0x461   : > { %v3624_v14 = vsel %vm3616_vm6, %v3612_v39, %v3508_v30 }
 0x462   : > { %v3500_v21 = vpop.permute.xlu0 %3499 }
 0x463   : > { %v3615_v46 = vsel %vm1721_vm10, %v5990_v45, %v3500_v21 }
 0x464   : > { %v3526_v12 = vpop.permute.xlu1 %3525  ;;  %v3626_v59 = vsel %vm3616_vm6, %v3615_v46, %v3510_v34 }
 0x466   : > { %v3540_v13 = vpop.permute.xlu0 %3539 }
 0x468   : > { %v3546_v44 = vpop.permute.xlu1 %3545 }
 0x46a   : > { %v3550_v24 = vpop.permute.xlu0 %3549 }
 0x46c   : > { %v3516_v7 = vpop.permute.xlu1 %3515 }
 0x46e   : > { %v3588_v28 = vpop.permute.xlu0 %3587 }
 0x46f   : > { %v3728_v11 = vsel %vm3717_vm15, %v3588_v28, %v3598_v16  ;;  %v4116_v16 = vld [vmem:[%s5942_s3] sm:$0xff]  }
 0x470   : > { %v3556_v63 = vpop.permute.xlu1 %3555 }
 0x472   : > { %v3518_v31 = vpop.permute.xlu0 %3517 }
 0x473   : > { %v3634_v49 = vsel %vm1758_vm4, %v3624_v14, %v3518_v31 }
 0x474   : > { %v3645_v1 = vsel %vm3637_vm7, %v3634_v49, %v5828_v42  ;;  %v3576_v51 = vpop.permute.xlu1 %3575 }
 0x476   : > { %v3538_v34 = vpop.permute.xlu0 %3537 }
 0x477   : > { %v3656_v26 = vsel %vm3648_vm8, %v3645_v1, %v3538_v34 }
 0x478   : > { %v3596_v2 = vpop.permute.xlu1 %3595  ;;  %v3667_v53 = vsel %vm3659_vm9, %v3656_v26, %v5836_v47 }
 0x479   : > { %v3677_v62 = vsel %vm1691_vm13, %v3667_v53, %v5849_v43 }
 0x47a   : > { %v3520_v29 = vpop.permute.xlu0 %3519  ;;  %v3688_v58 = vsel %vm3680_vm11, %v3677_v62, %v5840_v18 }
 0x47b   : > { %v3636_v32 = vsel %vm1758_vm4, %v3626_v59, %v3520_v29  ;;  %v3699_v54 = vsel %vm3691_vm12, %v3688_v58, %v5857_v56 }
 0x47c   : > { %v3647_v41 = vsel %vm3637_vm7, %v3636_v32, %v5830_v10  ;;  %v3713_v18 = vsel %vm3702_vm14, %v3699_v54, %v3588_v28 }
 0x47d   : > { %v3658_v22 = vsel %vm3648_vm8, %v3647_v41, %v3540_v13 }
 0x47e   : > { %v3566_v9 = vpop.permute.xlu0 %3565  ;;  %v3669_v47 = vsel %vm3659_vm9, %v3658_v22, %v3550_v24 }
 0x482   : > { %v3586_v25 = vpop.permute.xlu0 %3585 }
 0x483   : > { %v3725_v3 = vsel %vm3717_vm15, %v3586_v25, %v3596_v2 }
 0x484   : > { %3763 = vmatprep.subr.bf16.mxu1 %v3725_v3 }
 0x486   : > { %v3496_v36 = vpop.permute.xlu0 %3495 }
 0x487   : > { %v3609_v42 = vsel %vm1721_vm10, %v3385_v8, %v3496_v36  ;;  %v3570_v8 = vpop.permute.xlu1 %3569  ;;  %vm3754_vm10 = vcmask 1043456  }
 0x488   : > { %v3622_v61 = vsel %vm3616_vm6, %v3609_v42, %v3506_v50 }
 0x489   : > { %v3632_v10 = vsel %vm1758_vm4, %v3622_v61, %v3516_v7 }
 0x48a   : > { %v3643_v6 = vsel %vm3637_vm7, %v3632_v10, %v3526_v12  ;;  %v3536_v0 = vpop.permute.xlu0 %3535 }
 0x48b   : > { %v3654_v57 = vsel %vm3648_vm8, %v3643_v6, %v3536_v0  ;;  %v3590_v48 = vpop.permute.xlu1 %3589 }
 0x48c   : > { %v3665_v35 = vsel %vm3659_vm9, %v3654_v57, %v3546_v44 }
 0x48d   : > { %v3675_v17 = vsel %vm1691_vm13, %v3665_v35, %v3556_v63 }
 0x48e   : > { %v3560_v15 = vpop.permute.xlu0 %3559  ;;  %v3686_v5 = vsel %vm3680_vm11, %v3675_v17, %v3566_v9 }
 0x48f   : > { %v3679_v55 = vsel %vm1691_vm13, %v3669_v47, %v3560_v15  ;;  %v3697_v43 = vsel %vm3691_vm12, %v3686_v5, %v3576_v51  ;;  %vm3822_vm13 = vcmask 130052  }
 0x490   : > { %v3710_v19 = vsel %vm3702_vm14, %v3697_v43, %v3586_v25  ;;  %v3690_v27 = vsel %vm3680_vm11, %v3679_v55, %v3570_v8  ;;  %vm3823_vm1 = vmor %vm3822_vm13, %vm3754_vm10 }
 0x491   : > { %3764 = vmatpush1.bf16.msra.mxu1 %v3710_v19  ;;  %v3739_v30 = vpop.permute.xlu1 %3738 }
 0x492   : > { %v3580_v33 = vpop.permute.xlu0 %3579  ;;  %3765 = vmatprep.subr.bf16.mxu1 %v3728_v11 }
 0x493   : > { %v3701_v23 = vsel %vm3691_vm12, %v3690_v27, %v3580_v33 }
 0x494   : > { %v3716_v20 = vsel %vm3702_vm14, %v3701_v23, %v3590_v48 }
 0x495   : > { %3766 = vmatpush1.bf16.msra.mxu1 %v3713_v18  ;;  %v3755_v56 = vsel %vm3754_vm10, %v3716_v20, 0 }
 0x496   : > { %v3600_v37 = vpop.permute.xlu0 %3599 }
 0x497   : > { %v3731_v60 = vsel %vm3717_vm15, %v3590_v48, %v3600_v37 }
 0x498   : > { %4041 = vmatprep.subr.msk.bf16.mxu1 %vm3754_vm10, %v3731_v60 }
 0x499   : > { %3768 = vmatpush1.bf16.msra.mxu1 %v3755_v56 }
 0x49c   : > { %4042 = vmatmul.mubr.msk.bf16.vlgmr.msra.gmra.mrb[0].mxu1 %vm3659_vm9, %v4116_v16 }
 0x4a7   : > { %v3744_v50 = vpop.permute.xlu0 %3743 }
 0x56f   : > { %v3793_v4 = vpop.f32.mrb[0].mxu1 }
 0x570   : > { %v3794_v21 = vadd.f32 %v3793_v4, %v3739_v30  ;;  %v3795_v45 = vpop.f32.mrb[1].mxu1 }
 0x571   : > { %v3796_v46 = vadd.f32 %v3795_v45, %v3739_v30  ;;  %v3797_v12 = vpop.f32.mrb[2].mxu1 }
 0x572   : > { %v3802_v59 = vmul.f32 0.1, %v3794_v21  ;;  %v3798_v13 = vadd.f32 %v3797_v12, %v3744_v50  ;;  %v3799_v44 = vpop.f32.mrb[3].mxu1 }
 0x573   : > { %v3803_v24 = vmul.f32 0.1, %v3796_v46  ;;  %v3800_v28 = vadd.f32 %v3799_v44, %v3744_v50 }
 0x574   : > { %v3806_v7 = vmax.f32 %v3794_v21, %v3802_v59  ;;  %v3804_v52 = vmul.f32 0.1, %v3798_v13 }
 0x575   : > { %v3807_v38 = vmax.f32 %v3796_v46, %v3803_v24  ;;  %v3805_v40 = vmul.f32 0.1, %v3800_v28 }
 0x576   : > { %v3808_v39 = vmax.f32 %v3798_v13, %v3804_v52 }
 0x577   : > { %v4050_v14 = vpack.c.bf16 %v3807_v38, %v3806_v7  ;;  %v3827_v31 = vsel %vm3826_vm0, %v3807_v38, 0.0  ;;  %v3809_v49 = vmax.f32 %v3800_v28, %v3805_v40 }
 0x578   : > { %v3828_v1 = vadd.f32 %v3827_v31, %v3806_v7 }
 0x579   : > { %v4051_v63 = vpack.c.bf16 %v3809_v49, %v3808_v39  ;;  %v3831_v34 = vsel %vm3826_vm0, %v3809_v49, 0.0  ;;  %3824 = vst.msk [vmem:[%s301_s17] sm:$0xff] %vm3823_vm1, %v4050_v14 }
 0x57a   : > { %3829 = vadd.xlane.f32.xlu1 %v3828_v1  ;;  %v3832_v29 = vadd.f32 %v3831_v34, %v3808_v39 }
 0x57b   : > { %3825 = vst.msk [vmem:[%s301_s17 + $0x8] sm:$0xff] %vm3823_vm1, %v4051_v63 }
 0x57c   : > { %3833 = vadd.xlane.f32.xlu0 %v3832_v29 }
 0x607   : > { %v3830_v32 = vpop.xlane.xlu1 %3829 }
 0x608   : > { %3836 = vst.msk [vmem:[%s311_s19] sm:$0xff] %vm3835_vm2, %v3830_v32 }
 0x609   : > { %v3834_v51 = vpop.xlane.xlu0 %3833 }
 0x60a   : > { %3837 = vst.msk [vmem:[%s311_s19 + $0x8] sm:$0xff] %vm3835_vm2, %v3834_v51 }
 0x60b PF: > { %s17_s23 = sadd.s32 1, %s4139_s23   ;;  %s5994_s21 = smov %s4135_s22 }
 0x60c   : > { %p14_p5 = scmp.ge.s32.totalorder %s17_s23, 4   ;;  %s5995_s22 = smov %s5997_s24 }
 0x60e   :  { %16 = sbr.rel (!%p14_p5) target bundleno = 2 (0x2), region = 82 }

</bundles_post_ra>
